<compile_context>
chip_gen: v6e
topology: v6e:2x2x1
jax: 0.10.0
libtpu: 0.0.40
codegen_flags: <defaults>
</compile_context>

<pallas_src>
import functools

import numpy as np

import jax
import jax.numpy as jnp
from jax.experimental import pallas as pl
from jax.experimental.pallas import tpu as pltpu


def _cnf_rk4_kernel(num_steps,
                    dt_ref, x0_ref, h0_ref, w21_ref, w2_ref, b2_ref, wvec_ref,
                    c_ref, z_ref, lp_ref):
    """Single invocation: integrates all num_steps RK4 steps and writes the
    full (num_steps+1, B, D) / (num_steps+1, B, 1) trajectories.

    State carried across steps: x (B,D), lp (B,1) and h = x@W1 + b1 + t*wt (B,H).
    """
    dt = dt_ref[0]                      # SMEM scalar (no recompile per segment)

    # Parameters loaded once (hoisted out of all 4*num_steps stage evaluations).
    w21 = w21_ref[...]                  # (H, H)  = W2 @ W1   (f32, precomputed)
    w2 = w2_ref[...]                    # (H, D)
    b2 = b2_ref[...]                    # (1, D)
    wvec = wvec_ref[...]                # (1, H)  = b2 @ W1 + wt
    c_col = c_ref[...]                  # (H, 1)  exact-trace weights as a column

    half = 0.5 * dt
    sixth = dt / 6.0
    c_half = half * wvec                # (1, H)  hoisted per-stage bias increment
    c_full = dt * wvec                  # (1, H)

    x = x0_ref[...]                                   # (B, D) f32
    h = h0_ref[...]                                   # (B, H) = x0@W1 + b1 + t0*wt
    lp = jnp.zeros((x.shape[0], 1), jnp.float32)      # (B, 1)

    # Initial condition at t0.
    z_ref[0] = x
    lp_ref[0] = lp

    # Static, fully-unrolled time loop (num_steps is small); every time index is
    # a compile-time constant, so all trajectory stores are static-index stores.
    for k in range(num_steps):
        # ---- serial critical path: tanh (EUP) -> th@W21 (MXU), 4x per step ----
        th1 = jnp.tanh(h)
        g1 = jnp.dot(th1, w21, preferred_element_type=jnp.float32)
        th2 = jnp.tanh(h + half * g1 + c_half)
        g2 = jnp.dot(th2, w21, preferred_element_type=jnp.float32)
        th3 = jnp.tanh(h + half * g2 + c_half)
        g3 = jnp.dot(th3, w21, preferred_element_type=jnp.float32)
        th4 = jnp.tanh(h + dt * g3 + c_full)
        g4 = jnp.dot(th4, w21, preferred_element_type=jnp.float32)
        h = h + sixth * (g1 + 2.0 * (g2 + g3) + g4) + c_full

        # ---- off-critical-path: x trajectory + log-density (overlaps next step) ----
        th_sum = th1 + 2.0 * (th2 + th3) + th4                       # (B, H)
        sprime = ((1.0 - th1 * th1) + 2.0 * (1.0 - th2 * th2)
                  + 2.0 * (1.0 - th3 * th3) + (1.0 - th4 * th4))     # (B, H)
        x = x + sixth * jnp.dot(th_sum, w2,
                                preferred_element_type=jnp.float32) + dt * b2
        # div-weighted sum via MXU matmul against c column (no XLU lane reduce).
        lp = lp - sixth * jnp.dot(sprime, c_col,
                                  preferred_element_type=jnp.float32)

        z_ref[k + 1] = x
        lp_ref[k + 1] = lp


def cnf_forward(x, params, *, Tk_1, Tk, num_int_pts, reverse=False,
                batch_block=None):
    """Mirrors CNF.forward: integrate (x, dlogpx=0) over linspace(Tk_1, Tk, N+1).

    Returns (predz, dlogpx) with shapes ((N+1, B, D), (N+1, B)).
    `batch_block`: optional batch tile size (<B, multiple of 8) to expose a
    'parallel' grid axis (useful on v7x's two TensorCores once B >= 16).
    """
    W1, b1, wt, W2, b2 = params
    B, D = x.shape
    H = W1.shape[1]
    N = int(num_int_pts)

    bb = B if batch_block is None else int(batch_block)
    assert B % bb == 0
    n_b = B // bb

    f32 = jnp.float32
    hi = jax.lax.Precision.HIGHEST

    # integration_times = linspace(Tk_1, Tk, N+1), optionally flipped.  Fixed-step
    # RK4 only needs (t0, dt); kept as traced f32 scalars so changing Tk_1/Tk or
    # reverse does NOT recompile (dt reaches the kernel via SMEM).
    t_lo = jnp.asarray(Tk_1, f32)
    t_hi = jnp.asarray(Tk, f32)
    if reverse:
        t0, t1 = t_hi, t_lo
    else:
        t0, t1 = t_lo, t_hi
    dt = (t1 - t0) / N
    dt_arr = jnp.reshape(dt, (1,)).astype(f32)

    # Parameter glue (plain JAX, f32 / HIGHEST precision one-time cost):
    W1f = W1.astype(f32)
    W2f = W2.astype(f32)
    b1r = b1.reshape(1, H).astype(f32)
    wtr = wt.reshape(1, H).astype(f32)
    b2r = b2.reshape(1, D).astype(f32)

    W21 = jnp.dot(W2f, W1f, precision=hi)                       # (H, H)
    b2W1 = jnp.dot(b2r, W1f, precision=hi)                      # (1, H)
    wvec = b2W1 + wtr                                           # (1, H)
    c_col = jnp.sum(W1f * W2f.T, axis=0).reshape(H, 1)          # (H, 1)
    h0 = jnp.dot(x.astype(f32), W1f, precision=hi) + b1r + t0 * wtr   # (B, H)

    kernel = functools.partial(_cnf_rk4_kernel, N)

    grid_spec = pltpu.PrefetchScalarGridSpec(
        num_scalar_prefetch=0,
        grid=(n_b,),   # whole time integration inside each program invocation
        in_specs=[
            pl.BlockSpec(memory_space=pltpu.MemorySpace.SMEM),   # dt (scalar)
            pl.BlockSpec((bb, D), lambda i: (i, 0)),             # x0
            pl.BlockSpec((bb, H), lambda i: (i, 0)),             # h0 = x0@W1+b1+t0*wt
            pl.BlockSpec((H, H), lambda i: (0, 0)),              # W21 = W2@W1
            pl.BlockSpec((H, D), lambda i: (0, 0)),              # W2
            pl.BlockSpec((1, D), lambda i: (0, 0)),              # b2
            pl.BlockSpec((1, H), lambda i: (0, 0)),              # wvec = b2@W1 + wt
            pl.BlockSpec((H, 1), lambda i: (0, 0)),              # c (trace weights, column)
        ],
        out_specs=[
            pl.BlockSpec((N + 1, bb, D), lambda i: (0, i, 0)),   # predz trajectory
            pl.BlockSpec((N + 1, bb, 1), lambda i: (0, i, 0)),   # dlogpx trajectory
        ],
    )

    predz, dlogpx = pl.pallas_call(
        kernel,
        out_shape=(jax.ShapeDtypeStruct((N + 1, B, D), f32),
                   jax.ShapeDtypeStruct((N + 1, B, 1), f32)),
        grid_spec=grid_spec,
        compiler_params=pltpu.CompilerParams(dimension_semantics=("parallel",)),
    )(dt_arr, x.astype(f32), h0, W21, W2f, b2r, wvec, c_col)

    return predz, dlogpx[..., 0]


# --------------- pure-numpy (float64) reference, for correctness check ---------------
def _cnf_forward_ref(x, params, *, Tk_1, Tk, num_int_pts, reverse=False):
    W1, b1, wt, W2, b2 = [np.asarray(p, np.float64) for p in params]
    z = np.asarray(x, np.float64)
    N = int(num_int_pts)
    if reverse:
        t0, dt = float(Tk), (float(Tk_1) - float(Tk)) / N
    else:
        t0, dt = float(Tk_1), (float(Tk) - float(Tk_1)) / N
    c = np.sum(W1 * W2.T, axis=0)

    def odefunc(t, zz):
        h = zz @ W1 + b1 + t * wt
        th = np.tanh(h)
        dx = th @ W2 + b2
        div = np.sum((1.0 - th * th) * c, axis=-1)
        return dx, -div

    zs = [z]
    lp = np.zeros((z.shape[0],), np.float64)
    lps = [lp]
    for k in range(N):
        t_a = t0 + k * dt
        k1x, k1l = odefunc(t_a, z)
        k2x, k2l = odefunc(t_a + 0.5 * dt, z + 0.5 * dt * k1x)
        k3x, k3l = odefunc(t_a + 0.5 * dt, z + 0.5 * dt * k2x)
        k4x, k4l = odefunc(t_a + dt, z + dt * k3x)
        z = z + (dt / 6.0) * (k1x + 2 * k2x + 2 * k3x + k4x)
        lp = lp + (dt / 6.0) * (k1l + 2 * k2l + 2 * k3l + k4l)
        zs.append(z)
        lps.append(lp)
    return np.stack(zs, 0), np.stack(lps, 0)


if __name__ == "__main__":
    B, D, H = 8, 4, 32
    num_int_pts = 8
    Tk_1, Tk = 0.0, 1.0

    key = jax.random.PRNGKey(0)
    kx, k1, k2, k3, k4, k5 = jax.random.split(key, 6)
    x = jax.random.normal(kx, (B, D), jnp.float32)
    W1 = 0.1 * jax.random.normal(k1, (D, H), jnp.float32)
    b1 = 0.1 * jax.random.normal(k2, (H,), jnp.float32)
    wt = 0.1 * jax.random.normal(k3, (H,), jnp.float32)
    W2 = 0.1 * jax.random.normal(k4, (H, D), jnp.float32)
    b2 = 0.1 * jax.random.normal(k5, (D,), jnp.float32)
    params = (W1, b1, wt, W2, b2)

    predz, dlogpx = cnf_forward(x, params, Tk_1=Tk_1, Tk=Tk,
                                num_int_pts=num_int_pts, reverse=False)
    jax.block_until_ready((predz, dlogpx))

    predz_ref, dlogpx_ref = _cnf_forward_ref(
        np.asarray(x), tuple(np.asarray(p) for p in params),
        Tk_1=Tk_1, Tk=Tk, num_int_pts=num_int_pts, reverse=False)

    assert predz.shape == (num_int_pts + 1, B, D)
    assert dlogpx.shape == (num_int_pts + 1, B)
    # Tolerance accounts for default-precision (bf16-pass) MXU matmuls in the
    # kernel vs. the float64 reference, accumulated over N RK4 steps.
    assert np.allclose(np.asarray(predz), predz_ref, rtol=1e-2, atol=1e-2)
    assert np.allclose(np.asarray(dlogpx), dlogpx_ref, rtol=1e-2, atol=1e-2)

    print("KERNEL_OK")
</pallas_src>

<mosaic_0001>
module attributes {stable_mosaic.version = 11 : i64} {
  func.func @_cnf_rk4_kernel(%arg0: i32, %arg1: memref<1xf32, #tpu.memory_space<smem>>, %arg2: memref<8x4xf32, #tpu.memory_space<vmem>>, %arg3: memref<8x32xf32, #tpu.memory_space<vmem>>, %arg4: memref<32x32xf32, #tpu.memory_space<vmem>>, %arg5: memref<32x4xf32, #tpu.memory_space<vmem>>, %arg6: memref<1x4xf32, #tpu.memory_space<vmem>>, %arg7: memref<1x32xf32, #tpu.memory_space<vmem>>, %arg8: memref<32x1xf32, #tpu.memory_space<vmem>>, %arg9: memref<9x8x4xf32, #tpu.memory_space<vmem>>, %arg10: memref<9x8x1xf32, #tpu.memory_space<vmem>>) attributes {dimension_semantics = [#tpu.dimension_semantics<parallel>], iteration_bounds = array<i64: 1>, scalar_prefetch = 0 : i64, scratch_operands = 0 : i64, tpu.core_type = #tpu.core_type<tc>, window_params = [{transform_indices = @transform_0, window_bounds = array<i64: 1>}, {transform_indices = @transform_1, window_bounds = array<i64: 8, 4>}, {transform_indices = @transform_2, window_bounds = array<i64: 8, 32>}, {pipeline_mode = #tpu.pipeline_mode<synchronous>, transform_indices = @transform_3, window_bounds = array<i64: 32, 32>}, {pipeline_mode = #tpu.pipeline_mode<synchronous>, transform_indices = @transform_4, window_bounds = array<i64: 32, 4>}, {pipeline_mode = #tpu.pipeline_mode<synchronous>, transform_indices = @transform_5, window_bounds = array<i64: 1, 4>}, {pipeline_mode = #tpu.pipeline_mode<synchronous>, transform_indices = @transform_6, window_bounds = array<i64: 1, 32>}, {pipeline_mode = #tpu.pipeline_mode<synchronous>, transform_indices = @transform_7, window_bounds = array<i64: 32, 1>}, {transform_indices = @transform_8, window_bounds = array<i64: 9, 8, 4>}, {transform_indices = @transform_9, window_bounds = array<i64: 9, 8, 1>}]} {
    %c0 = arith.constant 0 : index
    %0 = memref.load %arg1[%c0] : memref<1xf32, #tpu.memory_space<smem>>
    %c0_0 = arith.constant 0 : index
    %c0_1 = arith.constant 0 : index
    %1 = vector.load %arg4[%c0_0, %c0_1] : memref<32x32xf32, #tpu.memory_space<vmem>>, vector<32x32xf32>
    %c0_2 = arith.constant 0 : index
    %c0_3 = arith.constant 0 : index
    %2 = vector.load %arg5[%c0_2, %c0_3] : memref<32x4xf32, #tpu.memory_space<vmem>>, vector<32x4xf32>
    %c0_4 = arith.constant 0 : index
    %c0_5 = arith.constant 0 : index
    %3 = vector.load %arg6[%c0_4, %c0_5] : memref<1x4xf32, #tpu.memory_space<vmem>>, vector<1x4xf32>
    %c0_6 = arith.constant 0 : index
    %c0_7 = arith.constant 0 : index
    %4 = vector.load %arg7[%c0_6, %c0_7] : memref<1x32xf32, #tpu.memory_space<vmem>>, vector<1x32xf32>
    %c0_8 = arith.constant 0 : index
    %c0_9 = arith.constant 0 : index
    %5 = vector.load %arg8[%c0_8, %c0_9] : memref<32x1xf32, #tpu.memory_space<vmem>>, vector<32x1xf32>
    %cst = arith.constant 5.000000e-01 : f32
    %6 = arith.mulf %cst, %0 : f32
    %cst_10 = arith.constant 6.000000e+00 : f32
    %7 = arith.divf %0, %cst_10 : f32
    %8 = vector.broadcast %6 : f32 to vector<1x32xf32>
    %9 = arith.mulf %8, %4 : vector<1x32xf32>
    %10 = vector.broadcast %0 : f32 to vector<1x32xf32>
    %11 = arith.mulf %10, %4 : vector<1x32xf32>
    %c0_11 = arith.constant 0 : index
    %c0_12 = arith.constant 0 : index
    %12 = vector.load %arg2[%c0_11, %c0_12] : memref<8x4xf32, #tpu.memory_space<vmem>>, vector<8x4xf32>
    %c0_13 = arith.constant 0 : index
    %c0_14 = arith.constant 0 : index
    %13 = vector.load %arg3[%c0_13, %c0_14] : memref<8x32xf32, #tpu.memory_space<vmem>>, vector<8x32xf32>
    %cst_15 = arith.constant 0.000000e+00 : f32
    %14 = vector.broadcast %cst_15 : f32 to vector<8x1xf32>
    %c0_16 = arith.constant 0 : index
    %c0_17 = arith.constant 0 : index
    %c0_18 = arith.constant 0 : index
    %15 = vector.load %arg9[%c0_16, %c0_17, %c0_18] : memref<9x8x4xf32, #tpu.memory_space<vmem>>, vector<1x8x4xf32>
    %16 = vector.shape_cast %15 : vector<1x8x4xf32> to vector<8x4xf32>
    %17 = vector.shape_cast %12 : vector<8x4xf32> to vector<1x8x4xf32>
    tpu.vector_store %arg9[%c0_16, %c0_17, %c0_18], %17 {strides = array<i32>} : memref<9x8x4xf32, #tpu.memory_space<vmem>>, vector<1x8x4xf32>,
    %c0_19 = arith.constant 0 : index
    %c0_20 = arith.constant 0 : index
    %c0_21 = arith.constant 0 : index
    %18 = vector.load %arg10[%c0_19, %c0_20, %c0_21] : memref<9x8x1xf32, #tpu.memory_space<vmem>>, vector<1x8x1xf32>
    %19 = vector.shape_cast %18 : vector<1x8x1xf32> to vector<8x1xf32>
    %20 = vector.shape_cast %14 : vector<8x1xf32> to vector<1x8x1xf32>
    tpu.vector_store %arg10[%c0_19, %c0_20, %c0_21], %20 {strides = array<i32>} : memref<9x8x1xf32, #tpu.memory_space<vmem>>, vector<1x8x1xf32>,
    %21 = math.tanh %13 : vector<8x32xf32>
    %cst_22 = arith.constant dense<0.000000e+00> : vector<8x32xf32>
    %22 = tpu.matmul %21, %1, %cst_22 {dimension_numbers = #tpu.dot_dimension_numbers<[1], [0], [0], [1], [0, 0, 1, 1], [], []>} : vector<8x32xf32>, vector<32x32xf32>, vector<8x32xf32> -> vector<8x32xf32>
    %23 = vector.broadcast %6 : f32 to vector<8x32xf32>
    %24 = arith.mulf %23, %22 : vector<8x32xf32>
    %25 = arith.addf %13, %24 : vector<8x32xf32>
    %26 = vector.broadcast %9 : vector<1x32xf32> to vector<8x32xf32>
    %27 = arith.addf %25, %26 : vector<8x32xf32>
    %28 = math.tanh %27 : vector<8x32xf32>
    %cst_23 = arith.constant dense<0.000000e+00> : vector<8x32xf32>
    %29 = tpu.matmul %28, %1, %cst_23 {dimension_numbers = #tpu.dot_dimension_numbers<[1], [0], [0], [1], [0, 0, 1, 1], [], []>} : vector<8x32xf32>, vector<32x32xf32>, vector<8x32xf32> -> vector<8x32xf32>
    %30 = vector.broadcast %6 : f32 to vector<8x32xf32>
    %31 = arith.mulf %30, %29 : vector<8x32xf32>
    %32 = arith.addf %13, %31 : vector<8x32xf32>
    %33 = vector.broadcast %9 : vector<1x32xf32> to vector<8x32xf32>
    %34 = arith.addf %32, %33 : vector<8x32xf32>
    %35 = math.tanh %34 : vector<8x32xf32>
    %cst_24 = arith.constant dense<0.000000e+00> : vector<8x32xf32>
    %36 = tpu.matmul %35, %1, %cst_24 {dimension_numbers = #tpu.dot_dimension_numbers<[1], [0], [0], [1], [0, 0, 1, 1], [], []>} : vector<8x32xf32>, vector<32x32xf32>, vector<8x32xf32> -> vector<8x32xf32>
    %37 = vector.broadcast %0 : f32 to vector<8x32xf32>
    %38 = arith.mulf %37, %36 : vector<8x32xf32>
    %39 = arith.addf %13, %38 : vector<8x32xf32>
    %40 = vector.broadcast %11 : vector<1x32xf32> to vector<8x32xf32>
    %41 = arith.addf %39, %40 : vector<8x32xf32>
    %42 = math.tanh %41 : vector<8x32xf32>
    %cst_25 = arith.constant dense<0.000000e+00> : vector<8x32xf32>
    %43 = tpu.matmul %42, %1, %cst_25 {dimension_numbers = #tpu.dot_dimension_numbers<[1], [0], [0], [1], [0, 0, 1, 1], [], []>} : vector<8x32xf32>, vector<32x32xf32>, vector<8x32xf32> -> vector<8x32xf32>
    %44 = arith.addf %29, %36 : vector<8x32xf32>
    %cst_26 = arith.constant 2.000000e+00 : f32
    %45 = vector.broadcast %cst_26 : f32 to vector<8x32xf32>
    %46 = arith.mulf %45, %44 : vector<8x32xf32>
    %47 = arith.addf %22, %46 : vector<8x32xf32>
    %48 = arith.addf %47, %43 : vector<8x32xf32>
    %49 = vector.broadcast %7 : f32 to vector<8x32xf32>
    %50 = arith.mulf %49, %48 : vector<8x32xf32>
    %51 = arith.addf %13, %50 : vector<8x32xf32>
    %52 = vector.broadcast %11 : vector<1x32xf32> to vector<8x32xf32>
    %53 = arith.addf %51, %52 : vector<8x32xf32>
    %54 = arith.addf %28, %35 : vector<8x32xf32>
    %cst_27 = arith.constant 2.000000e+00 : f32
    %55 = vector.broadcast %cst_27 : f32 to vector<8x32xf32>
    %56 = arith.mulf %55, %54 : vector<8x32xf32>
    %57 = arith.addf %21, %56 : vector<8x32xf32>
    %58 = arith.addf %57, %42 : vector<8x32xf32>
    %59 = arith.mulf %21, %21 : vector<8x32xf32>
    %cst_28 = arith.constant 1.000000e+00 : f32
    %60 = vector.broadcast %cst_28 : f32 to vector<8x32xf32>
    %61 = arith.subf %60, %59 : vector<8x32xf32>
    %62 = arith.mulf %28, %28 : vector<8x32xf32>
    %cst_29 = arith.constant 1.000000e+00 : f32
    %63 = vector.broadcast %cst_29 : f32 to vector<8x32xf32>
    %64 = arith.subf %63, %62 : vector<8x32xf32>
    %cst_30 = arith.constant 2.000000e+00 : f32
    %65 = vector.broadcast %cst_30 : f32 to vector<8x32xf32>
    %66 = arith.mulf %65, %64 : vector<8x32xf32>
    %67 = arith.addf %61, %66 : vector<8x32xf32>
    %68 = arith.mulf %35, %35 : vector<8x32xf32>
    %cst_31 = arith.constant 1.000000e+00 : f32
    %69 = vector.broadcast %cst_31 : f32 to vector<8x32xf32>
    %70 = arith.subf %69, %68 : vector<8x32xf32>
    %cst_32 = arith.constant 2.000000e+00 : f32
    %71 = vector.broadcast %cst_32 : f32 to vector<8x32xf32>
    %72 = arith.mulf %71, %70 : vector<8x32xf32>
    %73 = arith.addf %67, %72 : vector<8x32xf32>
    %74 = arith.mulf %42, %42 : vector<8x32xf32>
    %cst_33 = arith.constant 1.000000e+00 : f32
    %75 = vector.broadcast %cst_33 : f32 to vector<8x32xf32>
    %76 = arith.subf %75, %74 : vector<8x32xf32>
    %77 = arith.addf %73, %76 : vector<8x32xf32>
    %cst_34 = arith.constant dense<0.000000e+00> : vector<8x4xf32>
    %78 = tpu.matmul %58, %2, %cst_34 {dimension_numbers = #tpu.dot_dimension_numbers<[1], [0], [0], [1], [0, 0, 1, 1], [], []>} : vector<8x32xf32>, vector<32x4xf32>, vector<8x4xf32> -> vector<8x4xf32>
    %79 = vector.broadcast %7 : f32 to vector<8x4xf32>
    %80 = arith.mulf %79, %78 : vector<8x4xf32>
    %81 = arith.addf %12, %80 : vector<8x4xf32>
    %82 = vector.broadcast %0 : f32 to vector<1x4xf32>
    %83 = arith.mulf %82, %3 : vector<1x4xf32>
    %84 = vector.broadcast %83 : vector<1x4xf32> to vector<8x4xf32>
    %85 = arith.addf %81, %84 : vector<8x4xf32>
    %cst_35 = arith.constant dense<0.000000e+00> : vector<8x1xf32>
    %86 = tpu.matmul %77, %5, %cst_35 {dimension_numbers = #tpu.dot_dimension_numbers<[1], [0], [0], [1], [0, 0, 1, 1], [], []>} : vector<8x32xf32>, vector<32x1xf32>, vector<8x1xf32> -> vector<8x1xf32>
    %87 = vector.broadcast %7 : f32 to vector<8x1xf32>
    %88 = arith.mulf %87, %86 : vector<8x1xf32>
    %89 = arith.subf %14, %88 : vector<8x1xf32>
    %c1 = arith.constant 1 : index
    %c0_36 = arith.constant 0 : index
    %c0_37 = arith.constant 0 : index
    %90 = vector.load %arg9[%c1, %c0_36, %c0_37] : memref<9x8x4xf32, #tpu.memory_space<vmem>>, vector<1x8x4xf32>
    %91 = vector.shape_cast %90 : vector<1x8x4xf32> to vector<8x4xf32>
    %92 = vector.shape_cast %85 : vector<8x4xf32> to vector<1x8x4xf32>
    tpu.vector_store %arg9[%c1, %c0_36, %c0_37], %92 {strides = array<i32>} : memref<9x8x4xf32, #tpu.memory_space<vmem>>, vector<1x8x4xf32>,
    %c1_38 = arith.constant 1 : index
    %c0_39 = arith.constant 0 : index
    %c0_40 = arith.constant 0 : index
    %93 = vector.load %arg10[%c1_38, %c0_39, %c0_40] : memref<9x8x1xf32, #tpu.memory_space<vmem>>, vector<1x8x1xf32>
    %94 = vector.shape_cast %93 : vector<1x8x1xf32> to vector<8x1xf32>
    %95 = vector.shape_cast %89 : vector<8x1xf32> to vector<1x8x1xf32>
    tpu.vector_store %arg10[%c1_38, %c0_39, %c0_40], %95 {strides = array<i32>} : memref<9x8x1xf32, #tpu.memory_space<vmem>>, vector<1x8x1xf32>,
    %96 = math.tanh %53 : vector<8x32xf32>
    %cst_41 = arith.constant dense<0.000000e+00> : vector<8x32xf32>
    %97 = tpu.matmul %96, %1, %cst_41 {dimension_numbers = #tpu.dot_dimension_numbers<[1], [0], [0], [1], [0, 0, 1, 1], [], []>} : vector<8x32xf32>, vector<32x32xf32>, vector<8x32xf32> -> vector<8x32xf32>
    %98 = vector.broadcast %6 : f32 to vector<8x32xf32>
    %99 = arith.mulf %98, %97 : vector<8x32xf32>
    %100 = arith.addf %53, %99 : vector<8x32xf32>
    %101 = vector.broadcast %9 : vector<1x32xf32> to vector<8x32xf32>
    %102 = arith.addf %100, %101 : vector<8x32xf32>
    %103 = math.tanh %102 : vector<8x32xf32>
    %cst_42 = arith.constant dense<0.000000e+00> : vector<8x32xf32>
    %104 = tpu.matmul %103, %1, %cst_42 {dimension_numbers = #tpu.dot_dimension_numbers<[1], [0], [0], [1], [0, 0, 1, 1], [], []>} : vector<8x32xf32>, vector<32x32xf32>, vector<8x32xf32> -> vector<8x32xf32>
    %105 = vector.broadcast %6 : f32 to vector<8x32xf32>
    %106 = arith.mulf %105, %104 : vector<8x32xf32>
    %107 = arith.addf %53, %106 : vector<8x32xf32>
    %108 = vector.broadcast %9 : vector<1x32xf32> to vector<8x32xf32>
    %109 = arith.addf %107, %108 : vector<8x32xf32>
    %110 = math.tanh %109 : vector<8x32xf32>
    %cst_43 = arith.constant dense<0.000000e+00> : vector<8x32xf32>
    %111 = tpu.matmul %110, %1, %cst_43 {dimension_numbers = #tpu.dot_dimension_numbers<[1], [0], [0], [1], [0, 0, 1, 1], [], []>} : vector<8x32xf32>, vector<32x32xf32>, vector<8x32xf32> -> vector<8x32xf32>
    %112 = vector.broadcast %0 : f32 to vector<8x32xf32>
    %113 = arith.mulf %112, %111 : vector<8x32xf32>
    %114 = arith.addf %53, %113 : vector<8x32xf32>
    %115 = vector.broadcast %11 : vector<1x32xf32> to vector<8x32xf32>
    %116 = arith.addf %114, %115 : vector<8x32xf32>
    %117 = math.tanh %116 : vector<8x32xf32>
    %cst_44 = arith.constant dense<0.000000e+00> : vector<8x32xf32>
    %118 = tpu.matmul %117, %1, %cst_44 {dimension_numbers = #tpu.dot_dimension_numbers<[1], [0], [0], [1], [0, 0, 1, 1], [], []>} : vector<8x32xf32>, vector<32x32xf32>, vector<8x32xf32> -> vector<8x32xf32>
    %119 = arith.addf %104, %111 : vector<8x32xf32>
    %cst_45 = arith.constant 2.000000e+00 : f32
    %120 = vector.broadcast %cst_45 : f32 to vector<8x32xf32>
    %121 = arith.mulf %120, %119 : vector<8x32xf32>
    %122 = arith.addf %97, %121 : vector<8x32xf32>
    %123 = arith.addf %122, %118 : vector<8x32xf32>
    %124 = vector.broadcast %7 : f32 to vector<8x32xf32>
    %125 = arith.mulf %124, %123 : vector<8x32xf32>
    %126 = arith.addf %53, %125 : vector<8x32xf32>
    %127 = vector.broadcast %11 : vector<1x32xf32> to vector<8x32xf32>
    %128 = arith.addf %126, %127 : vector<8x32xf32>
    %129 = arith.addf %103, %110 : vector<8x32xf32>
    %cst_46 = arith.constant 2.000000e+00 : f32
    %130 = vector.broadcast %cst_46 : f32 to vector<8x32xf32>
    %131 = arith.mulf %130, %129 : vector<8x32xf32>
    %132 = arith.addf %96, %131 : vector<8x32xf32>
    %133 = arith.addf %132, %117 : vector<8x32xf32>
    %134 = arith.mulf %96, %96 : vector<8x32xf32>
    %cst_47 = arith.constant 1.000000e+00 : f32
    %135 = vector.broadcast %cst_47 : f32 to vector<8x32xf32>
    %136 = arith.subf %135, %134 : vector<8x32xf32>
    %137 = arith.mulf %103, %103 : vector<8x32xf32>
    %cst_48 = arith.constant 1.000000e+00 : f32
    %138 = vector.broadcast %cst_48 : f32 to vector<8x32xf32>
    %139 = arith.subf %138, %137 : vector<8x32xf32>
    %cst_49 = arith.constant 2.000000e+00 : f32
    %140 = vector.broadcast %cst_49 : f32 to vector<8x32xf32>
    %141 = arith.mulf %140, %139 : vector<8x32xf32>
    %142 = arith.addf %136, %141 : vector<8x32xf32>
    %143 = arith.mulf %110, %110 : vector<8x32xf32>
    %cst_50 = arith.constant 1.000000e+00 : f32
    %144 = vector.broadcast %cst_50 : f32 to vector<8x32xf32>
    %145 = arith.subf %144, %143 : vector<8x32xf32>
    %cst_51 = arith.constant 2.000000e+00 : f32
    %146 = vector.broadcast %cst_51 : f32 to vector<8x32xf32>
    %147 = arith.mulf %146, %145 : vector<8x32xf32>
    %148 = arith.addf %142, %147 : vector<8x32xf32>
    %149 = arith.mulf %117, %117 : vector<8x32xf32>
    %cst_52 = arith.constant 1.000000e+00 : f32
    %150 = vector.broadcast %cst_52 : f32 to vector<8x32xf32>
    %151 = arith.subf %150, %149 : vector<8x32xf32>
    %152 = arith.addf %148, %151 : vector<8x32xf32>
    %cst_53 = arith.constant dense<0.000000e+00> : vector<8x4xf32>
    %153 = tpu.matmul %133, %2, %cst_53 {dimension_numbers = #tpu.dot_dimension_numbers<[1], [0], [0], [1], [0, 0, 1, 1], [], []>} : vector<8x32xf32>, vector<32x4xf32>, vector<8x4xf32> -> vector<8x4xf32>
    %154 = vector.broadcast %7 : f32 to vector<8x4xf32>
    %155 = arith.mulf %154, %153 : vector<8x4xf32>
    %156 = arith.addf %85, %155 : vector<8x4xf32>
    %157 = vector.broadcast %0 : f32 to vector<1x4xf32>
    %158 = arith.mulf %157, %3 : vector<1x4xf32>
    %159 = vector.broadcast %158 : vector<1x4xf32> to vector<8x4xf32>
    %160 = arith.addf %156, %159 : vector<8x4xf32>
    %cst_54 = arith.constant dense<0.000000e+00> : vector<8x1xf32>
    %161 = tpu.matmul %152, %5, %cst_54 {dimension_numbers = #tpu.dot_dimension_numbers<[1], [0], [0], [1], [0, 0, 1, 1], [], []>} : vector<8x32xf32>, vector<32x1xf32>, vector<8x1xf32> -> vector<8x1xf32>
    %162 = vector.broadcast %7 : f32 to vector<8x1xf32>
    %163 = arith.mulf %162, %161 : vector<8x1xf32>
    %164 = arith.subf %89, %163 : vector<8x1xf32>
    %c2 = arith.constant 2 : index
    %c0_55 = arith.constant 0 : index
    %c0_56 = arith.constant 0 : index
    %165 = vector.load %arg9[%c2, %c0_55, %c0_56] : memref<9x8x4xf32, #tpu.memory_space<vmem>>, vector<1x8x4xf32>
    %166 = vector.shape_cast %165 : vector<1x8x4xf32> to vector<8x4xf32>
    %167 = vector.shape_cast %160 : vector<8x4xf32> to vector<1x8x4xf32>
    tpu.vector_store %arg9[%c2, %c0_55, %c0_56], %167 {strides = array<i32>} : memref<9x8x4xf32, #tpu.memory_space<vmem>>, vector<1x8x4xf32>,
    %c2_57 = arith.constant 2 : index
    %c0_58 = arith.constant 0 : index
    %c0_59 = arith.constant 0 : index
    %168 = vector.load %arg10[%c2_57, %c0_58, %c0_59] : memref<9x8x1xf32, #tpu.memory_space<vmem>>, vector<1x8x1xf32>
    %169 = vector.shape_cast %168 : vector<1x8x1xf32> to vector<8x1xf32>
    %170 = vector.shape_cast %164 : vector<8x1xf32> to vector<1x8x1xf32>
    tpu.vector_store %arg10[%c2_57, %c0_58, %c0_59], %170 {strides = array<i32>} : memref<9x8x1xf32, #tpu.memory_space<vmem>>, vector<1x8x1xf32>,
    %171 = math.tanh %128 : vector<8x32xf32>
    %cst_60 = arith.constant dense<0.000000e+00> : vector<8x32xf32>
    %172 = tpu.matmul %171, %1, %cst_60 {dimension_numbers = #tpu.dot_dimension_numbers<[1], [0], [0], [1], [0, 0, 1, 1], [], []>} : vector<8x32xf32>, vector<32x32xf32>, vector<8x32xf32> -> vector<8x32xf32>
    %173 = vector.broadcast %6 : f32 to vector<8x32xf32>
    %174 = arith.mulf %173, %172 : vector<8x32xf32>
    %175 = arith.addf %128, %174 : vector<8x32xf32>
    %176 = vector.broadcast %9 : vector<1x32xf32> to vector<8x32xf32>
    %177 = arith.addf %175, %176 : vector<8x32xf32>
    %178 = math.tanh %177 : vector<8x32xf32>
    %cst_61 = arith.constant dense<0.000000e+00> : vector<8x32xf32>
    %179 = tpu.matmul %178, %1, %cst_61 {dimension_numbers = #tpu.dot_dimension_numbers<[1], [0], [0], [1], [0, 0, 1, 1], [], []>} : vector<8x32xf32>, vector<32x32xf32>, vector<8x32xf32> -> vector<8x32xf32>
    %180 = vector.broadcast %6 : f32 to vector<8x32xf32>
    %181 = arith.mulf %180, %179 : vector<8x32xf32>
    %182 = arith.addf %128, %181 : vector<8x32xf32>
    %183 = vector.broadcast %9 : vector<1x32xf32> to vector<8x32xf32>
    %184 = arith.addf %182, %183 : vector<8x32xf32>
    %185 = math.tanh %184 : vector<8x32xf32>
    %cst_62 = arith.constant dense<0.000000e+00> : vector<8x32xf32>
    %186 = tpu.matmul %185, %1, %cst_62 {dimension_numbers = #tpu.dot_dimension_numbers<[1], [0], [0], [1], [0, 0, 1, 1], [], []>} : vector<8x32xf32>, vector<32x32xf32>, vector<8x32xf32> -> vector<8x32xf32>
    %187 = vector.broadcast %0 : f32 to vector<8x32xf32>
    %188 = arith.mulf %187, %186 : vector<8x32xf32>
    %189 = arith.addf %128, %188 : vector<8x32xf32>
    %190 = vector.broadcast %11 : vector<1x32xf32> to vector<8x32xf32>
    %191 = arith.addf %189, %190 : vector<8x32xf32>
    %192 = math.tanh %191 : vector<8x32xf32>
    %cst_63 = arith.constant dense<0.000000e+00> : vector<8x32xf32>
    %193 = tpu.matmul %192, %1, %cst_63 {dimension_numbers = #tpu.dot_dimension_numbers<[1], [0], [0], [1], [0, 0, 1, 1], [], []>} : vector<8x32xf32>, vector<32x32xf32>, vector<8x32xf32> -> vector<8x32xf32>
    %194 = arith.addf %179, %186 : vector<8x32xf32>
    %cst_64 = arith.constant 2.000000e+00 : f32
    %195 = vector.broadcast %cst_64 : f32 to vector<8x32xf32>
    %196 = arith.mulf %195, %194 : vector<8x32xf32>
    %197 = arith.addf %172, %196 : vector<8x32xf32>
    %198 = arith.addf %197, %193 : vector<8x32xf32>
    %199 = vector.broadcast %7 : f32 to vector<8x32xf32>
    %200 = arith.mulf %199, %198 : vector<8x32xf32>
    %201 = arith.addf %128, %200 : vector<8x32xf32>
    %202 = vector.broadcast %11 : vector<1x32xf32> to vector<8x32xf32>
    %203 = arith.addf %201, %202 : vector<8x32xf32>
    %204 = arith.addf %178, %185 : vector<8x32xf32>
    %cst_65 = arith.constant 2.000000e+00 : f32
    %205 = vector.broadcast %cst_65 : f32 to vector<8x32xf32>
    %206 = arith.mulf %205, %204 : vector<8x32xf32>
    %207 = arith.addf %171, %206 : vector<8x32xf32>
    %208 = arith.addf %207, %192 : vector<8x32xf32>
    %209 = arith.mulf %171, %171 : vector<8x32xf32>
    %cst_66 = arith.constant 1.000000e+00 : f32
    %210 = vector.broadcast %cst_66 : f32 to vector<8x32xf32>
    %211 = arith.subf %210, %209 : vector<8x32xf32>
    %212 = arith.mulf %178, %178 : vector<8x32xf32>
    %cst_67 = arith.constant 1.000000e+00 : f32
    %213 = vector.broadcast %cst_67 : f32 to vector<8x32xf32>
    %214 = arith.subf %213, %212 : vector<8x32xf32>
    %cst_68 = arith.constant 2.000000e+00 : f32
    %215 = vector.broadcast %cst_68 : f32 to vector<8x32xf32>
    %216 = arith.mulf %215, %214 : vector<8x32xf32>
    %217 = arith.addf %211, %216 : vector<8x32xf32>
    %218 = arith.mulf %185, %185 : vector<8x32xf32>
    %cst_69 = arith.constant 1.000000e+00 : f32
    %219 = vector.broadcast %cst_69 : f32 to vector<8x32xf32>
    %220 = arith.subf %219, %218 : vector<8x32xf32>
    %cst_70 = arith.constant 2.000000e+00 : f32
    %221 = vector.broadcast %cst_70 : f32 to vector<8x32xf32>
    %222 = arith.mulf %221, %220 : vector<8x32xf32>
    %223 = arith.addf %217, %222 : vector<8x32xf32>
    %224 = arith.mulf %192, %192 : vector<8x32xf32>
    %cst_71 = arith.constant 1.000000e+00 : f32
    %225 = vector.broadcast %cst_71 : f32 to vector<8x32xf32>
    %226 = arith.subf %225, %224 : vector<8x32xf32>
    %227 = arith.addf %223, %226 : vector<8x32xf32>
    %cst_72 = arith.constant dense<0.000000e+00> : vector<8x4xf32>
    %228 = tpu.matmul %208, %2, %cst_72 {dimension_numbers = #tpu.dot_dimension_numbers<[1], [0], [0], [1], [0, 0, 1, 1], [], []>} : vector<8x32xf32>, vector<32x4xf32>, vector<8x4xf32> -> vector<8x4xf32>
    %229 = vector.broadcast %7 : f32 to vector<8x4xf32>
    %230 = arith.mulf %229, %228 : vector<8x4xf32>
    %231 = arith.addf %160, %230 : vector<8x4xf32>
    %232 = vector.broadcast %0 : f32 to vector<1x4xf32>
    %233 = arith.mulf %232, %3 : vector<1x4xf32>
    %234 = vector.broadcast %233 : vector<1x4xf32> to vector<8x4xf32>
    %235 = arith.addf %231, %234 : vector<8x4xf32>
    %cst_73 = arith.constant dense<0.000000e+00> : vector<8x1xf32>
    %236 = tpu.matmul %227, %5, %cst_73 {dimension_numbers = #tpu.dot_dimension_numbers<[1], [0], [0], [1], [0, 0, 1, 1], [], []>} : vector<8x32xf32>, vector<32x1xf32>, vector<8x1xf32> -> vector<8x1xf32>
    %237 = vector.broadcast %7 : f32 to vector<8x1xf32>
    %238 = arith.mulf %237, %236 : vector<8x1xf32>
    %239 = arith.subf %164, %238 : vector<8x1xf32>
    %c3 = arith.constant 3 : index
    %c0_74 = arith.constant 0 : index
    %c0_75 = arith.constant 0 : index
    %240 = vector.load %arg9[%c3, %c0_74, %c0_75] : memref<9x8x4xf32, #tpu.memory_space<vmem>>, vector<1x8x4xf32>
    %241 = vector.shape_cast %240 : vector<1x8x4xf32> to vector<8x4xf32>
    %242 = vector.shape_cast %235 : vector<8x4xf32> to vector<1x8x4xf32>
    tpu.vector_store %arg9[%c3, %c0_74, %c0_75], %242 {strides = array<i32>} : memref<9x8x4xf32, #tpu.memory_space<vmem>>, vector<1x8x4xf32>,
    %c3_76 = arith.constant 3 : index
    %c0_77 = arith.constant 0 : index
    %c0_78 = arith.constant 0 : index
    %243 = vector.load %arg10[%c3_76, %c0_77, %c0_78] : memref<9x8x1xf32, #tpu.memory_space<vmem>>, vector<1x8x1xf32>
    %244 = vector.shape_cast %243 : vector<1x8x1xf32> to vector<8x1xf32>
    %245 = vector.shape_cast %239 : vector<8x1xf32> to vector<1x8x1xf32>
    tpu.vector_store %arg10[%c3_76, %c0_77, %c0_78], %245 {strides = array<i32>} : memref<9x8x1xf32, #tpu.memory_space<vmem>>, vector<1x8x1xf32>,
    %246 = math.tanh %203 : vector<8x32xf32>
    %cst_79 = arith.constant dense<0.000000e+00> : vector<8x32xf32>
    %247 = tpu.matmul %246, %1, %cst_79 {dimension_numbers = #tpu.dot_dimension_numbers<[1], [0], [0], [1], [0, 0, 1, 1], [], []>} : vector<8x32xf32>, vector<32x32xf32>, vector<8x32xf32> -> vector<8x32xf32>
    %248 = vector.broadcast %6 : f32 to vector<8x32xf32>
    %249 = arith.mulf %248, %247 : vector<8x32xf32>
    %250 = arith.addf %203, %249 : vector<8x32xf32>
    %251 = vector.broadcast %9 : vector<1x32xf32> to vector<8x32xf32>
    %252 = arith.addf %250, %251 : vector<8x32xf32>
    %253 = math.tanh %252 : vector<8x32xf32>
    %cst_80 = arith.constant dense<0.000000e+00> : vector<8x32xf32>
    %254 = tpu.matmul %253, %1, %cst_80 {dimension_numbers = #tpu.dot_dimension_numbers<[1], [0], [0], [1], [0, 0, 1, 1], [], []>} : vector<8x32xf32>, vector<32x32xf32>, vector<8x32xf32> -> vector<8x32xf32>
    %255 = vector.broadcast %6 : f32 to vector<8x32xf32>
    %256 = arith.mulf %255, %254 : vector<8x32xf32>
    %257 = arith.addf %203, %256 : vector<8x32xf32>
    %258 = vector.broadcast %9 : vector<1x32xf32> to vector<8x32xf32>
    %259 = arith.addf %257, %258 : vector<8x32xf32>
    %260 = math.tanh %259 : vector<8x32xf32>
    %cst_81 = arith.constant dense<0.000000e+00> : vector<8x32xf32>
    %261 = tpu.matmul %260, %1, %cst_81 {dimension_numbers = #tpu.dot_dimension_numbers<[1], [0], [0], [1], [0, 0, 1, 1], [], []>} : vector<8x32xf32>, vector<32x32xf32>, vector<8x32xf32> -> vector<8x32xf32>
    %262 = vector.broadcast %0 : f32 to vector<8x32xf32>
    %263 = arith.mulf %262, %261 : vector<8x32xf32>
    %264 = arith.addf %203, %263 : vector<8x32xf32>
    %265 = vector.broadcast %11 : vector<1x32xf32> to vector<8x32xf32>
    %266 = arith.addf %264, %265 : vector<8x32xf32>
    %267 = math.tanh %266 : vector<8x32xf32>
    %cst_82 = arith.constant dense<0.000000e+00> : vector<8x32xf32>
    %268 = tpu.matmul %267, %1, %cst_82 {dimension_numbers = #tpu.dot_dimension_numbers<[1], [0], [0], [1], [0, 0, 1, 1], [], []>} : vector<8x32xf32>, vector<32x32xf32>, vector<8x32xf32> -> vector<8x32xf32>
    %269 = arith.addf %254, %261 : vector<8x32xf32>
    %cst_83 = arith.constant 2.000000e+00 : f32
    %270 = vector.broadcast %cst_83 : f32 to vector<8x32xf32>
    %271 = arith.mulf %270, %269 : vector<8x32xf32>
    %272 = arith.addf %247, %271 : vector<8x32xf32>
    %273 = arith.addf %272, %268 : vector<8x32xf32>
    %274 = vector.broadcast %7 : f32 to vector<8x32xf32>
    %275 = arith.mulf %274, %273 : vector<8x32xf32>
    %276 = arith.addf %203, %275 : vector<8x32xf32>
    %277 = vector.broadcast %11 : vector<1x32xf32> to vector<8x32xf32>
    %278 = arith.addf %276, %277 : vector<8x32xf32>
    %279 = arith.addf %253, %260 : vector<8x32xf32>
    %cst_84 = arith.constant 2.000000e+00 : f32
    %280 = vector.broadcast %cst_84 : f32 to vector<8x32xf32>
    %281 = arith.mulf %280, %279 : vector<8x32xf32>
    %282 = arith.addf %246, %281 : vector<8x32xf32>
    %283 = arith.addf %282, %267 : vector<8x32xf32>
    %284 = arith.mulf %246, %246 : vector<8x32xf32>
    %cst_85 = arith.constant 1.000000e+00 : f32
    %285 = vector.broadcast %cst_85 : f32 to vector<8x32xf32>
    %286 = arith.subf %285, %284 : vector<8x32xf32>
    %287 = arith.mulf %253, %253 : vector<8x32xf32>
    %cst_86 = arith.constant 1.000000e+00 : f32
    %288 = vector.broadcast %cst_86 : f32 to vector<8x32xf32>
    %289 = arith.subf %288, %287 : vector<8x32xf32>
    %cst_87 = arith.constant 2.000000e+00 : f32
    %290 = vector.broadcast %cst_87 : f32 to vector<8x32xf32>
    %291 = arith.mulf %290, %289 : vector<8x32xf32>
    %292 = arith.addf %286, %291 : vector<8x32xf32>
    %293 = arith.mulf %260, %260 : vector<8x32xf32>
    %cst_88 = arith.constant 1.000000e+00 : f32
    %294 = vector.broadcast %cst_88 : f32 to vector<8x32xf32>
    %295 = arith.subf %294, %293 : vector<8x32xf32>
    %cst_89 = arith.constant 2.000000e+00 : f32
    %296 = vector.broadcast %cst_89 : f32 to vector<8x32xf32>
    %297 = arith.mulf %296, %295 : vector<8x32xf32>
    %298 = arith.addf %292, %297 : vector<8x32xf32>
    %299 = arith.mulf %267, %267 : vector<8x32xf32>
    %cst_90 = arith.constant 1.000000e+00 : f32
    %300 = vector.broadcast %cst_90 : f32 to vector<8x32xf32>
    %301 = arith.subf %300, %299 : vector<8x32xf32>
    %302 = arith.addf %298, %301 : vector<8x32xf32>
    %cst_91 = arith.constant dense<0.000000e+00> : vector<8x4xf32>
    %303 = tpu.matmul %283, %2, %cst_91 {dimension_numbers = #tpu.dot_dimension_numbers<[1], [0], [0], [1], [0, 0, 1, 1], [], []>} : vector<8x32xf32>, vector<32x4xf32>, vector<8x4xf32> -> vector<8x4xf32>
    %304 = vector.broadcast %7 : f32 to vector<8x4xf32>
    %305 = arith.mulf %304, %303 : vector<8x4xf32>
    %306 = arith.addf %235, %305 : vector<8x4xf32>
    %307 = vector.broadcast %0 : f32 to vector<1x4xf32>
    %308 = arith.mulf %307, %3 : vector<1x4xf32>
    %309 = vector.broadcast %308 : vector<1x4xf32> to vector<8x4xf32>
    %310 = arith.addf %306, %309 : vector<8x4xf32>
    %cst_92 = arith.constant dense<0.000000e+00> : vector<8x1xf32>
    %311 = tpu.matmul %302, %5, %cst_92 {dimension_numbers = #tpu.dot_dimension_numbers<[1], [0], [0], [1], [0, 0, 1, 1], [], []>} : vector<8x32xf32>, vector<32x1xf32>, vector<8x1xf32> -> vector<8x1xf32>
    %312 = vector.broadcast %7 : f32 to vector<8x1xf32>
    %313 = arith.mulf %312, %311 : vector<8x1xf32>
    %314 = arith.subf %239, %313 : vector<8x1xf32>
    %c4 = arith.constant 4 : index
    %c0_93 = arith.constant 0 : index
    %c0_94 = arith.constant 0 : index
    %315 = vector.load %arg9[%c4, %c0_93, %c0_94] : memref<9x8x4xf32, #tpu.memory_space<vmem>>, vector<1x8x4xf32>
    %316 = vector.shape_cast %315 : vector<1x8x4xf32> to vector<8x4xf32>
    %317 = vector.shape_cast %310 : vector<8x4xf32> to vector<1x8x4xf32>
    tpu.vector_store %arg9[%c4, %c0_93, %c0_94], %317 {strides = array<i32>} : memref<9x8x4xf32, #tpu.memory_space<vmem>>, vector<1x8x4xf32>,
    %c4_95 = arith.constant 4 : index
    %c0_96 = arith.constant 0 : index
    %c0_97 = arith.constant 0 : index
    %318 = vector.load %arg10[%c4_95, %c0_96, %c0_97] : memref<9x8x1xf32, #tpu.memory_space<vmem>>, vector<1x8x1xf32>
    %319 = vector.shape_cast %318 : vector<1x8x1xf32> to vector<8x1xf32>
    %320 = vector.shape_cast %314 : vector<8x1xf32> to vector<1x8x1xf32>
    tpu.vector_store %arg10[%c4_95, %c0_96, %c0_97], %320 {strides = array<i32>} : memref<9x8x1xf32, #tpu.memory_space<vmem>>, vector<1x8x1xf32>,
    %321 = math.tanh %278 : vector<8x32xf32>
    %cst_98 = arith.constant dense<0.000000e+00> : vector<8x32xf32>
    %322 = tpu.matmul %321, %1, %cst_98 {dimension_numbers = #tpu.dot_dimension_numbers<[1], [0], [0], [1], [0, 0, 1, 1], [], []>} : vector<8x32xf32>, vector<32x32xf32>, vector<8x32xf32> -> vector<8x32xf32>
    %323 = vector.broadcast %6 : f32 to vector<8x32xf32>
    %324 = arith.mulf %323, %322 : vector<8x32xf32>
    %325 = arith.addf %278, %324 : vector<8x32xf32>
    %326 = vector.broadcast %9 : vector<1x32xf32> to vector<8x32xf32>
    %327 = arith.addf %325, %326 : vector<8x32xf32>
    %328 = math.tanh %327 : vector<8x32xf32>
    %cst_99 = arith.constant dense<0.000000e+00> : vector<8x32xf32>
    %329 = tpu.matmul %328, %1, %cst_99 {dimension_numbers = #tpu.dot_dimension_numbers<[1], [0], [0], [1], [0, 0, 1, 1], [], []>} : vector<8x32xf32>, vector<32x32xf32>, vector<8x32xf32> -> vector<8x32xf32>
    %330 = vector.broadcast %6 : f32 to vector<8x32xf32>
    %331 = arith.mulf %330, %329 : vector<8x32xf32>
    %332 = arith.addf %278, %331 : vector<8x32xf32>
    %333 = vector.broadcast %9 : vector<1x32xf32> to vector<8x32xf32>
    %334 = arith.addf %332, %333 : vector<8x32xf32>
    %335 = math.tanh %334 : vector<8x32xf32>
    %cst_100 = arith.constant dense<0.000000e+00> : vector<8x32xf32>
    %336 = tpu.matmul %335, %1, %cst_100 {dimension_numbers = #tpu.dot_dimension_numbers<[1], [0], [0], [1], [0, 0, 1, 1], [], []>} : vector<8x32xf32>, vector<32x32xf32>, vector<8x32xf32> -> vector<8x32xf32>
    %337 = vector.broadcast %0 : f32 to vector<8x32xf32>
    %338 = arith.mulf %337, %336 : vector<8x32xf32>
    %339 = arith.addf %278, %338 : vector<8x32xf32>
    %340 = vector.broadcast %11 : vector<1x32xf32> to vector<8x32xf32>
    %341 = arith.addf %339, %340 : vector<8x32xf32>
    %342 = math.tanh %341 : vector<8x32xf32>
    %cst_101 = arith.constant dense<0.000000e+00> : vector<8x32xf32>
    %343 = tpu.matmul %342, %1, %cst_101 {dimension_numbers = #tpu.dot_dimension_numbers<[1], [0], [0], [1], [0, 0, 1, 1], [], []>} : vector<8x32xf32>, vector<32x32xf32>, vector<8x32xf32> -> vector<8x32xf32>
    %344 = arith.addf %329, %336 : vector<8x32xf32>
    %cst_102 = arith.constant 2.000000e+00 : f32
    %345 = vector.broadcast %cst_102 : f32 to vector<8x32xf32>
    %346 = arith.mulf %345, %344 : vector<8x32xf32>
    %347 = arith.addf %322, %346 : vector<8x32xf32>
    %348 = arith.addf %347, %343 : vector<8x32xf32>
    %349 = vector.broadcast %7 : f32 to vector<8x32xf32>
    %350 = arith.mulf %349, %348 : vector<8x32xf32>
    %351 = arith.addf %278, %350 : vector<8x32xf32>
    %352 = vector.broadcast %11 : vector<1x32xf32> to vector<8x32xf32>
    %353 = arith.addf %351, %352 : vector<8x32xf32>
    %354 = arith.addf %328, %335 : vector<8x32xf32>
    %cst_103 = arith.constant 2.000000e+00 : f32
    %355 = vector.broadcast %cst_103 : f32 to vector<8x32xf32>
    %356 = arith.mulf %355, %354 : vector<8x32xf32>
    %357 = arith.addf %321, %356 : vector<8x32xf32>
    %358 = arith.addf %357, %342 : vector<8x32xf32>
    %359 = arith.mulf %321, %321 : vector<8x32xf32>
    %cst_104 = arith.constant 1.000000e+00 : f32
    %360 = vector.broadcast %cst_104 : f32 to vector<8x32xf32>
    %361 = arith.subf %360, %359 : vector<8x32xf32>
    %362 = arith.mulf %328, %328 : vector<8x32xf32>
    %cst_105 = arith.constant 1.000000e+00 : f32
    %363 = vector.broadcast %cst_105 : f32 to vector<8x32xf32>
    %364 = arith.subf %363, %362 : vector<8x32xf32>
    %cst_106 = arith.constant 2.000000e+00 : f32
    %365 = vector.broadcast %cst_106 : f32 to vector<8x32xf32>
    %366 = arith.mulf %365, %364 : vector<8x32xf32>
    %367 = arith.addf %361, %366 : vector<8x32xf32>
    %368 = arith.mulf %335, %335 : vector<8x32xf32>
    %cst_107 = arith.constant 1.000000e+00 : f32
    %369 = vector.broadcast %cst_107 : f32 to vector<8x32xf32>
    %370 = arith.subf %369, %368 : vector<8x32xf32>
    %cst_108 = arith.constant 2.000000e+00 : f32
    %371 = vector.broadcast %cst_108 : f32 to vector<8x32xf32>
    %372 = arith.mulf %371, %370 : vector<8x32xf32>
    %373 = arith.addf %367, %372 : vector<8x32xf32>
    %374 = arith.mulf %342, %342 : vector<8x32xf32>
    %cst_109 = arith.constant 1.000000e+00 : f32
    %375 = vector.broadcast %cst_109 : f32 to vector<8x32xf32>
    %376 = arith.subf %375, %374 : vector<8x32xf32>
    %377 = arith.addf %373, %376 : vector<8x32xf32>
    %cst_110 = arith.constant dense<0.000000e+00> : vector<8x4xf32>
    %378 = tpu.matmul %358, %2, %cst_110 {dimension_numbers = #tpu.dot_dimension_numbers<[1], [0], [0], [1], [0, 0, 1, 1], [], []>} : vector<8x32xf32>, vector<32x4xf32>, vector<8x4xf32> -> vector<8x4xf32>
    %379 = vector.broadcast %7 : f32 to vector<8x4xf32>
    %380 = arith.mulf %379, %378 : vector<8x4xf32>
    %381 = arith.addf %310, %380 : vector<8x4xf32>
    %382 = vector.broadcast %0 : f32 to vector<1x4xf32>
    %383 = arith.mulf %382, %3 : vector<1x4xf32>
    %384 = vector.broadcast %383 : vector<1x4xf32> to vector<8x4xf32>
    %385 = arith.addf %381, %384 : vector<8x4xf32>
    %cst_111 = arith.constant dense<0.000000e+00> : vector<8x1xf32>
    %386 = tpu.matmul %377, %5, %cst_111 {dimension_numbers = #tpu.dot_dimension_numbers<[1], [0], [0], [1], [0, 0, 1, 1], [], []>} : vector<8x32xf32>, vector<32x1xf32>, vector<8x1xf32> -> vector<8x1xf32>
    %387 = vector.broadcast %7 : f32 to vector<8x1xf32>
    %388 = arith.mulf %387, %386 : vector<8x1xf32>
    %389 = arith.subf %314, %388 : vector<8x1xf32>
    %c5 = arith.constant 5 : index
    %c0_112 = arith.constant 0 : index
    %c0_113 = arith.constant 0 : index
    %390 = vector.load %arg9[%c5, %c0_112, %c0_113] : memref<9x8x4xf32, #tpu.memory_space<vmem>>, vector<1x8x4xf32>
    %391 = vector.shape_cast %390 : vector<1x8x4xf32> to vector<8x4xf32>
    %392 = vector.shape_cast %385 : vector<8x4xf32> to vector<1x8x4xf32>
    tpu.vector_store %arg9[%c5, %c0_112, %c0_113], %392 {strides = array<i32>} : memref<9x8x4xf32, #tpu.memory_space<vmem>>, vector<1x8x4xf32>,
    %c5_114 = arith.constant 5 : index
    %c0_115 = arith.constant 0 : index
    %c0_116 = arith.constant 0 : index
    %393 = vector.load %arg10[%c5_114, %c0_115, %c0_116] : memref<9x8x1xf32, #tpu.memory_space<vmem>>, vector<1x8x1xf32>
    %394 = vector.shape_cast %393 : vector<1x8x1xf32> to vector<8x1xf32>
    %395 = vector.shape_cast %389 : vector<8x1xf32> to vector<1x8x1xf32>
    tpu.vector_store %arg10[%c5_114, %c0_115, %c0_116], %395 {strides = array<i32>} : memref<9x8x1xf32, #tpu.memory_space<vmem>>, vector<1x8x1xf32>,
    %396 = math.tanh %353 : vector<8x32xf32>
    %cst_117 = arith.constant dense<0.000000e+00> : vector<8x32xf32>
    %397 = tpu.matmul %396, %1, %cst_117 {dimension_numbers = #tpu.dot_dimension_numbers<[1], [0], [0], [1], [0, 0, 1, 1], [], []>} : vector<8x32xf32>, vector<32x32xf32>, vector<8x32xf32> -> vector<8x32xf32>
    %398 = vector.broadcast %6 : f32 to vector<8x32xf32>
    %399 = arith.mulf %398, %397 : vector<8x32xf32>
    %400 = arith.addf %353, %399 : vector<8x32xf32>
    %401 = vector.broadcast %9 : vector<1x32xf32> to vector<8x32xf32>
    %402 = arith.addf %400, %401 : vector<8x32xf32>
    %403 = math.tanh %402 : vector<8x32xf32>
    %cst_118 = arith.constant dense<0.000000e+00> : vector<8x32xf32>
    %404 = tpu.matmul %403, %1, %cst_118 {dimension_numbers = #tpu.dot_dimension_numbers<[1], [0], [0], [1], [0, 0, 1, 1], [], []>} : vector<8x32xf32>, vector<32x32xf32>, vector<8x32xf32> -> vector<8x32xf32>
    %405 = vector.broadcast %6 : f32 to vector<8x32xf32>
    %406 = arith.mulf %405, %404 : vector<8x32xf32>
    %407 = arith.addf %353, %406 : vector<8x32xf32>
    %408 = vector.broadcast %9 : vector<1x32xf32> to vector<8x32xf32>
    %409 = arith.addf %407, %408 : vector<8x32xf32>
    %410 = math.tanh %409 : vector<8x32xf32>
    %cst_119 = arith.constant dense<0.000000e+00> : vector<8x32xf32>
    %411 = tpu.matmul %410, %1, %cst_119 {dimension_numbers = #tpu.dot_dimension_numbers<[1], [0], [0], [1], [0, 0, 1, 1], [], []>} : vector<8x32xf32>, vector<32x32xf32>, vector<8x32xf32> -> vector<8x32xf32>
    %412 = vector.broadcast %0 : f32 to vector<8x32xf32>
    %413 = arith.mulf %412, %411 : vector<8x32xf32>
    %414 = arith.addf %353, %413 : vector<8x32xf32>
    %415 = vector.broadcast %11 : vector<1x32xf32> to vector<8x32xf32>
    %416 = arith.addf %414, %415 : vector<8x32xf32>
    %417 = math.tanh %416 : vector<8x32xf32>
    %cst_120 = arith.constant dense<0.000000e+00> : vector<8x32xf32>
    %418 = tpu.matmul %417, %1, %cst_120 {dimension_numbers = #tpu.dot_dimension_numbers<[1], [0], [0], [1], [0, 0, 1, 1], [], []>} : vector<8x32xf32>, vector<32x32xf32>, vector<8x32xf32> -> vector<8x32xf32>
    %419 = arith.addf %404, %411 : vector<8x32xf32>
    %cst_121 = arith.constant 2.000000e+00 : f32
    %420 = vector.broadcast %cst_121 : f32 to vector<8x32xf32>
    %421 = arith.mulf %420, %419 : vector<8x32xf32>
    %422 = arith.addf %397, %421 : vector<8x32xf32>
    %423 = arith.addf %422, %418 : vector<8x32xf32>
    %424 = vector.broadcast %7 : f32 to vector<8x32xf32>
    %425 = arith.mulf %424, %423 : vector<8x32xf32>
    %426 = arith.addf %353, %425 : vector<8x32xf32>
    %427 = vector.broadcast %11 : vector<1x32xf32> to vector<8x32xf32>
    %428 = arith.addf %426, %427 : vector<8x32xf32>
    %429 = arith.addf %403, %410 : vector<8x32xf32>
    %cst_122 = arith.constant 2.000000e+00 : f32
    %430 = vector.broadcast %cst_122 : f32 to vector<8x32xf32>
    %431 = arith.mulf %430, %429 : vector<8x32xf32>
    %432 = arith.addf %396, %431 : vector<8x32xf32>
    %433 = arith.addf %432, %417 : vector<8x32xf32>
    %434 = arith.mulf %396, %396 : vector<8x32xf32>
    %cst_123 = arith.constant 1.000000e+00 : f32
    %435 = vector.broadcast %cst_123 : f32 to vector<8x32xf32>
    %436 = arith.subf %435, %434 : vector<8x32xf32>
    %437 = arith.mulf %403, %403 : vector<8x32xf32>
    %cst_124 = arith.constant 1.000000e+00 : f32
    %438 = vector.broadcast %cst_124 : f32 to vector<8x32xf32>
    %439 = arith.subf %438, %437 : vector<8x32xf32>
    %cst_125 = arith.constant 2.000000e+00 : f32
    %440 = vector.broadcast %cst_125 : f32 to vector<8x32xf32>
    %441 = arith.mulf %440, %439 : vector<8x32xf32>
    %442 = arith.addf %436, %441 : vector<8x32xf32>
    %443 = arith.mulf %410, %410 : vector<8x32xf32>
    %cst_126 = arith.constant 1.000000e+00 : f32
    %444 = vector.broadcast %cst_126 : f32 to vector<8x32xf32>
    %445 = arith.subf %444, %443 : vector<8x32xf32>
    %cst_127 = arith.constant 2.000000e+00 : f32
    %446 = vector.broadcast %cst_127 : f32 to vector<8x32xf32>
    %447 = arith.mulf %446, %445 : vector<8x32xf32>
    %448 = arith.addf %442, %447 : vector<8x32xf32>
    %449 = arith.mulf %417, %417 : vector<8x32xf32>
    %cst_128 = arith.constant 1.000000e+00 : f32
    %450 = vector.broadcast %cst_128 : f32 to vector<8x32xf32>
    %451 = arith.subf %450, %449 : vector<8x32xf32>
    %452 = arith.addf %448, %451 : vector<8x32xf32>
    %cst_129 = arith.constant dense<0.000000e+00> : vector<8x4xf32>
    %453 = tpu.matmul %433, %2, %cst_129 {dimension_numbers = #tpu.dot_dimension_numbers<[1], [0], [0], [1], [0, 0, 1, 1], [], []>} : vector<8x32xf32>, vector<32x4xf32>, vector<8x4xf32> -> vector<8x4xf32>
    %454 = vector.broadcast %7 : f32 to vector<8x4xf32>
    %455 = arith.mulf %454, %453 : vector<8x4xf32>
    %456 = arith.addf %385, %455 : vector<8x4xf32>
    %457 = vector.broadcast %0 : f32 to vector<1x4xf32>
    %458 = arith.mulf %457, %3 : vector<1x4xf32>
    %459 = vector.broadcast %458 : vector<1x4xf32> to vector<8x4xf32>
    %460 = arith.addf %456, %459 : vector<8x4xf32>
    %cst_130 = arith.constant dense<0.000000e+00> : vector<8x1xf32>
    %461 = tpu.matmul %452, %5, %cst_130 {dimension_numbers = #tpu.dot_dimension_numbers<[1], [0], [0], [1], [0, 0, 1, 1], [], []>} : vector<8x32xf32>, vector<32x1xf32>, vector<8x1xf32> -> vector<8x1xf32>
    %462 = vector.broadcast %7 : f32 to vector<8x1xf32>
    %463 = arith.mulf %462, %461 : vector<8x1xf32>
    %464 = arith.subf %389, %463 : vector<8x1xf32>
    %c6 = arith.constant 6 : index
    %c0_131 = arith.constant 0 : index
    %c0_132 = arith.constant 0 : index
    %465 = vector.load %arg9[%c6, %c0_131, %c0_132] : memref<9x8x4xf32, #tpu.memory_space<vmem>>, vector<1x8x4xf32>
    %466 = vector.shape_cast %465 : vector<1x8x4xf32> to vector<8x4xf32>
    %467 = vector.shape_cast %460 : vector<8x4xf32> to vector<1x8x4xf32>
    tpu.vector_store %arg9[%c6, %c0_131, %c0_132], %467 {strides = array<i32>} : memref<9x8x4xf32, #tpu.memory_space<vmem>>, vector<1x8x4xf32>,
    %c6_133 = arith.constant 6 : index
    %c0_134 = arith.constant 0 : index
    %c0_135 = arith.constant 0 : index
    %468 = vector.load %arg10[%c6_133, %c0_134, %c0_135] : memref<9x8x1xf32, #tpu.memory_space<vmem>>, vector<1x8x1xf32>
    %469 = vector.shape_cast %468 : vector<1x8x1xf32> to vector<8x1xf32>
    %470 = vector.shape_cast %464 : vector<8x1xf32> to vector<1x8x1xf32>
    tpu.vector_store %arg10[%c6_133, %c0_134, %c0_135], %470 {strides = array<i32>} : memref<9x8x1xf32, #tpu.memory_space<vmem>>, vector<1x8x1xf32>,
    %471 = math.tanh %428 : vector<8x32xf32>
    %cst_136 = arith.constant dense<0.000000e+00> : vector<8x32xf32>
    %472 = tpu.matmul %471, %1, %cst_136 {dimension_numbers = #tpu.dot_dimension_numbers<[1], [0], [0], [1], [0, 0, 1, 1], [], []>} : vector<8x32xf32>, vector<32x32xf32>, vector<8x32xf32> -> vector<8x32xf32>
    %473 = vector.broadcast %6 : f32 to vector<8x32xf32>
    %474 = arith.mulf %473, %472 : vector<8x32xf32>
    %475 = arith.addf %428, %474 : vector<8x32xf32>
    %476 = vector.broadcast %9 : vector<1x32xf32> to vector<8x32xf32>
    %477 = arith.addf %475, %476 : vector<8x32xf32>
    %478 = math.tanh %477 : vector<8x32xf32>
    %cst_137 = arith.constant dense<0.000000e+00> : vector<8x32xf32>
    %479 = tpu.matmul %478, %1, %cst_137 {dimension_numbers = #tpu.dot_dimension_numbers<[1], [0], [0], [1], [0, 0, 1, 1], [], []>} : vector<8x32xf32>, vector<32x32xf32>, vector<8x32xf32> -> vector<8x32xf32>
    %480 = vector.broadcast %6 : f32 to vector<8x32xf32>
    %481 = arith.mulf %480, %479 : vector<8x32xf32>
    %482 = arith.addf %428, %481 : vector<8x32xf32>
    %483 = vector.broadcast %9 : vector<1x32xf32> to vector<8x32xf32>
    %484 = arith.addf %482, %483 : vector<8x32xf32>
    %485 = math.tanh %484 : vector<8x32xf32>
    %cst_138 = arith.constant dense<0.000000e+00> : vector<8x32xf32>
    %486 = tpu.matmul %485, %1, %cst_138 {dimension_numbers = #tpu.dot_dimension_numbers<[1], [0], [0], [1], [0, 0, 1, 1], [], []>} : vector<8x32xf32>, vector<32x32xf32>, vector<8x32xf32> -> vector<8x32xf32>
    %487 = vector.broadcast %0 : f32 to vector<8x32xf32>
    %488 = arith.mulf %487, %486 : vector<8x32xf32>
    %489 = arith.addf %428, %488 : vector<8x32xf32>
    %490 = vector.broadcast %11 : vector<1x32xf32> to vector<8x32xf32>
    %491 = arith.addf %489, %490 : vector<8x32xf32>
    %492 = math.tanh %491 : vector<8x32xf32>
    %cst_139 = arith.constant dense<0.000000e+00> : vector<8x32xf32>
    %493 = tpu.matmul %492, %1, %cst_139 {dimension_numbers = #tpu.dot_dimension_numbers<[1], [0], [0], [1], [0, 0, 1, 1], [], []>} : vector<8x32xf32>, vector<32x32xf32>, vector<8x32xf32> -> vector<8x32xf32>
    %494 = arith.addf %479, %486 : vector<8x32xf32>
    %cst_140 = arith.constant 2.000000e+00 : f32
    %495 = vector.broadcast %cst_140 : f32 to vector<8x32xf32>
    %496 = arith.mulf %495, %494 : vector<8x32xf32>
    %497 = arith.addf %472, %496 : vector<8x32xf32>
    %498 = arith.addf %497, %493 : vector<8x32xf32>
    %499 = vector.broadcast %7 : f32 to vector<8x32xf32>
    %500 = arith.mulf %499, %498 : vector<8x32xf32>
    %501 = arith.addf %428, %500 : vector<8x32xf32>
    %502 = vector.broadcast %11 : vector<1x32xf32> to vector<8x32xf32>
    %503 = arith.addf %501, %502 : vector<8x32xf32>
    %504 = arith.addf %478, %485 : vector<8x32xf32>
    %cst_141 = arith.constant 2.000000e+00 : f32
    %505 = vector.broadcast %cst_141 : f32 to vector<8x32xf32>
    %506 = arith.mulf %505, %504 : vector<8x32xf32>
    %507 = arith.addf %471, %506 : vector<8x32xf32>
    %508 = arith.addf %507, %492 : vector<8x32xf32>
    %509 = arith.mulf %471, %471 : vector<8x32xf32>
    %cst_142 = arith.constant 1.000000e+00 : f32
    %510 = vector.broadcast %cst_142 : f32 to vector<8x32xf32>
    %511 = arith.subf %510, %509 : vector<8x32xf32>
    %512 = arith.mulf %478, %478 : vector<8x32xf32>
    %cst_143 = arith.constant 1.000000e+00 : f32
    %513 = vector.broadcast %cst_143 : f32 to vector<8x32xf32>
    %514 = arith.subf %513, %512 : vector<8x32xf32>
    %cst_144 = arith.constant 2.000000e+00 : f32
    %515 = vector.broadcast %cst_144 : f32 to vector<8x32xf32>
    %516 = arith.mulf %515, %514 : vector<8x32xf32>
    %517 = arith.addf %511, %516 : vector<8x32xf32>
    %518 = arith.mulf %485, %485 : vector<8x32xf32>
    %cst_145 = arith.constant 1.000000e+00 : f32
    %519 = vector.broadcast %cst_145 : f32 to vector<8x32xf32>
    %520 = arith.subf %519, %518 : vector<8x32xf32>
    %cst_146 = arith.constant 2.000000e+00 : f32
    %521 = vector.broadcast %cst_146 : f32 to vector<8x32xf32>
    %522 = arith.mulf %521, %520 : vector<8x32xf32>
    %523 = arith.addf %517, %522 : vector<8x32xf32>
    %524 = arith.mulf %492, %492 : vector<8x32xf32>
    %cst_147 = arith.constant 1.000000e+00 : f32
    %525 = vector.broadcast %cst_147 : f32 to vector<8x32xf32>
    %526 = arith.subf %525, %524 : vector<8x32xf32>
    %527 = arith.addf %523, %526 : vector<8x32xf32>
    %cst_148 = arith.constant dense<0.000000e+00> : vector<8x4xf32>
    %528 = tpu.matmul %508, %2, %cst_148 {dimension_numbers = #tpu.dot_dimension_numbers<[1], [0], [0], [1], [0, 0, 1, 1], [], []>} : vector<8x32xf32>, vector<32x4xf32>, vector<8x4xf32> -> vector<8x4xf32>
    %529 = vector.broadcast %7 : f32 to vector<8x4xf32>
    %530 = arith.mulf %529, %528 : vector<8x4xf32>
    %531 = arith.addf %460, %530 : vector<8x4xf32>
    %532 = vector.broadcast %0 : f32 to vector<1x4xf32>
    %533 = arith.mulf %532, %3 : vector<1x4xf32>
    %534 = vector.broadcast %533 : vector<1x4xf32> to vector<8x4xf32>
    %535 = arith.addf %531, %534 : vector<8x4xf32>
    %cst_149 = arith.constant dense<0.000000e+00> : vector<8x1xf32>
    %536 = tpu.matmul %527, %5, %cst_149 {dimension_numbers = #tpu.dot_dimension_numbers<[1], [0], [0], [1], [0, 0, 1, 1], [], []>} : vector<8x32xf32>, vector<32x1xf32>, vector<8x1xf32> -> vector<8x1xf32>
    %537 = vector.broadcast %7 : f32 to vector<8x1xf32>
    %538 = arith.mulf %537, %536 : vector<8x1xf32>
    %539 = arith.subf %464, %538 : vector<8x1xf32>
    %c7 = arith.constant 7 : index
    %c0_150 = arith.constant 0 : index
    %c0_151 = arith.constant 0 : index
    %540 = vector.load %arg9[%c7, %c0_150, %c0_151] : memref<9x8x4xf32, #tpu.memory_space<vmem>>, vector<1x8x4xf32>
    %541 = vector.shape_cast %540 : vector<1x8x4xf32> to vector<8x4xf32>
    %542 = vector.shape_cast %535 : vector<8x4xf32> to vector<1x8x4xf32>
    tpu.vector_store %arg9[%c7, %c0_150, %c0_151], %542 {strides = array<i32>} : memref<9x8x4xf32, #tpu.memory_space<vmem>>, vector<1x8x4xf32>,
    %c7_152 = arith.constant 7 : index
    %c0_153 = arith.constant 0 : index
    %c0_154 = arith.constant 0 : index
    %543 = vector.load %arg10[%c7_152, %c0_153, %c0_154] : memref<9x8x1xf32, #tpu.memory_space<vmem>>, vector<1x8x1xf32>
    %544 = vector.shape_cast %543 : vector<1x8x1xf32> to vector<8x1xf32>
    %545 = vector.shape_cast %539 : vector<8x1xf32> to vector<1x8x1xf32>
    tpu.vector_store %arg10[%c7_152, %c0_153, %c0_154], %545 {strides = array<i32>} : memref<9x8x1xf32, #tpu.memory_space<vmem>>, vector<1x8x1xf32>,
    %546 = math.tanh %503 : vector<8x32xf32>
    %cst_155 = arith.constant dense<0.000000e+00> : vector<8x32xf32>
    %547 = tpu.matmul %546, %1, %cst_155 {dimension_numbers = #tpu.dot_dimension_numbers<[1], [0], [0], [1], [0, 0, 1, 1], [], []>} : vector<8x32xf32>, vector<32x32xf32>, vector<8x32xf32> -> vector<8x32xf32>
    %548 = vector.broadcast %6 : f32 to vector<8x32xf32>
    %549 = arith.mulf %548, %547 : vector<8x32xf32>
    %550 = arith.addf %503, %549 : vector<8x32xf32>
    %551 = vector.broadcast %9 : vector<1x32xf32> to vector<8x32xf32>
    %552 = arith.addf %550, %551 : vector<8x32xf32>
    %553 = math.tanh %552 : vector<8x32xf32>
    %cst_156 = arith.constant dense<0.000000e+00> : vector<8x32xf32>
    %554 = tpu.matmul %553, %1, %cst_156 {dimension_numbers = #tpu.dot_dimension_numbers<[1], [0], [0], [1], [0, 0, 1, 1], [], []>} : vector<8x32xf32>, vector<32x32xf32>, vector<8x32xf32> -> vector<8x32xf32>
    %555 = vector.broadcast %6 : f32 to vector<8x32xf32>
    %556 = arith.mulf %555, %554 : vector<8x32xf32>
    %557 = arith.addf %503, %556 : vector<8x32xf32>
    %558 = vector.broadcast %9 : vector<1x32xf32> to vector<8x32xf32>
    %559 = arith.addf %557, %558 : vector<8x32xf32>
    %560 = math.tanh %559 : vector<8x32xf32>
    %cst_157 = arith.constant dense<0.000000e+00> : vector<8x32xf32>
    %561 = tpu.matmul %560, %1, %cst_157 {dimension_numbers = #tpu.dot_dimension_numbers<[1], [0], [0], [1], [0, 0, 1, 1], [], []>} : vector<8x32xf32>, vector<32x32xf32>, vector<8x32xf32> -> vector<8x32xf32>
    %562 = vector.broadcast %0 : f32 to vector<8x32xf32>
    %563 = arith.mulf %562, %561 : vector<8x32xf32>
    %564 = arith.addf %503, %563 : vector<8x32xf32>
    %565 = vector.broadcast %11 : vector<1x32xf32> to vector<8x32xf32>
    %566 = arith.addf %564, %565 : vector<8x32xf32>
    %567 = math.tanh %566 : vector<8x32xf32>
    %568 = arith.addf %553, %560 : vector<8x32xf32>
    %cst_158 = arith.constant 2.000000e+00 : f32
    %569 = vector.broadcast %cst_158 : f32 to vector<8x32xf32>
    %570 = arith.mulf %569, %568 : vector<8x32xf32>
    %571 = arith.addf %546, %570 : vector<8x32xf32>
    %572 = arith.addf %571, %567 : vector<8x32xf32>
    %573 = arith.mulf %546, %546 : vector<8x32xf32>
    %cst_159 = arith.constant 1.000000e+00 : f32
    %574 = vector.broadcast %cst_159 : f32 to vector<8x32xf32>
    %575 = arith.subf %574, %573 : vector<8x32xf32>
    %576 = arith.mulf %553, %553 : vector<8x32xf32>
    %cst_160 = arith.constant 1.000000e+00 : f32
    %577 = vector.broadcast %cst_160 : f32 to vector<8x32xf32>
    %578 = arith.subf %577, %576 : vector<8x32xf32>
    %cst_161 = arith.constant 2.000000e+00 : f32
    %579 = vector.broadcast %cst_161 : f32 to vector<8x32xf32>
    %580 = arith.mulf %579, %578 : vector<8x32xf32>
    %581 = arith.addf %575, %580 : vector<8x32xf32>
    %582 = arith.mulf %560, %560 : vector<8x32xf32>
    %cst_162 = arith.constant 1.000000e+00 : f32
    %583 = vector.broadcast %cst_162 : f32 to vector<8x32xf32>
    %584 = arith.subf %583, %582 : vector<8x32xf32>
    %cst_163 = arith.constant 2.000000e+00 : f32
    %585 = vector.broadcast %cst_163 : f32 to vector<8x32xf32>
    %586 = arith.mulf %585, %584 : vector<8x32xf32>
    %587 = arith.addf %581, %586 : vector<8x32xf32>
    %588 = arith.mulf %567, %567 : vector<8x32xf32>
    %cst_164 = arith.constant 1.000000e+00 : f32
    %589 = vector.broadcast %cst_164 : f32 to vector<8x32xf32>
    %590 = arith.subf %589, %588 : vector<8x32xf32>
    %591 = arith.addf %587, %590 : vector<8x32xf32>
    %cst_165 = arith.constant dense<0.000000e+00> : vector<8x4xf32>
    %592 = tpu.matmul %572, %2, %cst_165 {dimension_numbers = #tpu.dot_dimension_numbers<[1], [0], [0], [1], [0, 0, 1, 1], [], []>} : vector<8x32xf32>, vector<32x4xf32>, vector<8x4xf32> -> vector<8x4xf32>
    %593 = vector.broadcast %7 : f32 to vector<8x4xf32>
    %594 = arith.mulf %593, %592 : vector<8x4xf32>
    %595 = arith.addf %535, %594 : vector<8x4xf32>
    %596 = vector.broadcast %0 : f32 to vector<1x4xf32>
    %597 = arith.mulf %596, %3 : vector<1x4xf32>
    %598 = vector.broadcast %597 : vector<1x4xf32> to vector<8x4xf32>
    %599 = arith.addf %595, %598 : vector<8x4xf32>
    %cst_166 = arith.constant dense<0.000000e+00> : vector<8x1xf32>
    %600 = tpu.matmul %591, %5, %cst_166 {dimension_numbers = #tpu.dot_dimension_numbers<[1], [0], [0], [1], [0, 0, 1, 1], [], []>} : vector<8x32xf32>, vector<32x1xf32>, vector<8x1xf32> -> vector<8x1xf32>
    %601 = vector.broadcast %7 : f32 to vector<8x1xf32>
    %602 = arith.mulf %601, %600 : vector<8x1xf32>
    %603 = arith.subf %539, %602 : vector<8x1xf32>
    %c8 = arith.constant 8 : index
    %c0_167 = arith.constant 0 : index
    %c0_168 = arith.constant 0 : index
    %604 = vector.load %arg9[%c8, %c0_167, %c0_168] : memref<9x8x4xf32, #tpu.memory_space<vmem>>, vector<1x8x4xf32>
    %605 = vector.shape_cast %604 : vector<1x8x4xf32> to vector<8x4xf32>
    %606 = vector.shape_cast %599 : vector<8x4xf32> to vector<1x8x4xf32>
    tpu.vector_store %arg9[%c8, %c0_167, %c0_168], %606 {strides = array<i32>} : memref<9x8x4xf32, #tpu.memory_space<vmem>>, vector<1x8x4xf32>,
    %c8_169 = arith.constant 8 : index
    %c0_170 = arith.constant 0 : index
    %c0_171 = arith.constant 0 : index
    %607 = vector.load %arg10[%c8_169, %c0_170, %c0_171] : memref<9x8x1xf32, #tpu.memory_space<vmem>>, vector<1x8x1xf32>
    %608 = vector.shape_cast %607 : vector<1x8x1xf32> to vector<8x1xf32>
    %609 = vector.shape_cast %603 : vector<8x1xf32> to vector<1x8x1xf32>
    tpu.vector_store %arg10[%c8_169, %c0_170, %c0_171], %609 {strides = array<i32>} : memref<9x8x1xf32, #tpu.memory_space<vmem>>, vector<1x8x1xf32>,
    return
  }
  func.func @transform_0(%arg0: i32) -> i32 {
    %c0_i32 = arith.constant 0 : i32
    %c0_i32_0 = arith.constant 0 : i32
    return %c0_i32 : i32
  }
  func.func @transform_1(%arg0: i32) -> (i32, i32) {
    %c0_i32 = arith.constant 0 : i32
    %c0_i32_0 = arith.constant 0 : i32
    return %arg0, %c0_i32 : i32, i32
  }
  func.func @transform_2(%arg0: i32) -> (i32, i32) {
    %c0_i32 = arith.constant 0 : i32
    %c0_i32_0 = arith.constant 0 : i32
    return %arg0, %c0_i32 : i32, i32
  }
  func.func @transform_3(%arg0: i32) -> (i32, i32) {
    %c0_i32 = arith.constant 0 : i32
    %c0_i32_0 = arith.constant 0 : i32
    %c0_i32_1 = arith.constant 0 : i32
    return %c0_i32, %c0_i32_0 : i32, i32
  }
  func.func @transform_4(%arg0: i32) -> (i32, i32) {
    %c0_i32 = arith.constant 0 : i32
    %c0_i32_0 = arith.constant 0 : i32
    %c0_i32_1 = arith.constant 0 : i32
    return %c0_i32, %c0_i32_0 : i32, i32
  }
  func.func @transform_5(%arg0: i32) -> (i32, i32) {
    %c0_i32 = arith.constant 0 : i32
    %c0_i32_0 = arith.constant 0 : i32
    %c0_i32_1 = arith.constant 0 : i32
    return %c0_i32, %c0_i32_0 : i32, i32
  }
  func.func @transform_6(%arg0: i32) -> (i32, i32) {
    %c0_i32 = arith.constant 0 : i32
    %c0_i32_0 = arith.constant 0 : i32
    %c0_i32_1 = arith.constant 0 : i32
    return %c0_i32, %c0_i32_0 : i32, i32
  }
  func.func @transform_7(%arg0: i32) -> (i32, i32) {
    %c0_i32 = arith.constant 0 : i32
    %c0_i32_0 = arith.constant 0 : i32
    %c0_i32_1 = arith.constant 0 : i32
    return %c0_i32, %c0_i32_0 : i32, i32
  }
  func.func @transform_8(%arg0: i32) -> (i32, i32, i32) {
    %c0_i32 = arith.constant 0 : i32
    %c0_i32_0 = arith.constant 0 : i32
    %c0_i32_1 = arith.constant 0 : i32
    return %c0_i32, %arg0, %c0_i32_0 : i32, i32, i32
  }
  func.func @transform_9(%arg0: i32) -> (i32, i32, i32) {
    %c0_i32 = arith.constant 0 : i32
    %c0_i32_0 = arith.constant 0 : i32
    %c0_i32_1 = arith.constant 0 : i32
    return %c0_i32, %arg0, %c0_i32_0 : i32, i32, i32
  }
}

</mosaic_0001>

<bundles_post_ra>
// kernel: tpu_custom_call.1
= control target key start
LH: loop header
LB: loop body
LE: loop exit
PB: predicated region body
PF: predicated region fallthrough
CT: control target
= control target key end

     0   :  { %v4775_v0 = vmov 0.0   ;;  %vm4776_vm0 = vmmov 0   ;;  %vm62_vm1 = vcmask 261120   ;;  %v139_v7 = vlaneseq  ;;  %s5844_s3 = inlined_call_operand.vmem [shape: f32[32,32], index: 3, kind: input, shape index: {}]   ;;  %s5845_s2 = inlined_call_operand.vmem [shape: f32[8,32], index: 2, kind: input, shape index: {}]   ;;  %s5846_s0 = inlined_call_operand.<no memory space> [shape: f32[1], index: 0, kind: input, shape index: {}]   ;;  %s5847_s6 = inlined_call_operand.vmem [shape: f32[1,32], index: 6, kind: input, shape index: {}]   ;;  %s5848_s4 = inlined_call_operand.vmem [shape: f32[32,4], index: 4, kind: input, shape index: {}]   ;;  %s5849_s7 = inlined_call_operand.vmem [shape: f32[32,1], index: 7, kind: input, shape index: {}]   ;;  %s5850_s1 = inlined_call_operand.vmem [shape: f32[8,4], index: 1, kind: input, shape index: {}]   ;;  %s5851_s8 = inlined_call_operand.vmem [shape: f32[9,8,4], index: 8, kind: output, shape index: {0}]   ;;  %s5852_s9 = inlined_call_operand.vmem [shape: f32[9,8,1], index: 9, kind: output, shape index: {1}]   ;;  %s5853_s5 = inlined_call_operand.vmem [shape: f32[1,4], index: 5, kind: input, shape index: {}]  }
   0x1   :  { %4180 = vmatprep.subr.mxu0 %v4775_v0  ;;  %v4831_v1 = vld [vmem:[%s5844_s3 + $0x18] sm:$0xff]  ;;  %v4836_v2 = vld [vmem:[%s5844_s3 + $0x10] sm:$0xff]  ;;  %4188 = vmatprep.mubr.msk.f32.mxu0 %vm4776_vm0, %v4775_v0  ;;  %v4844_v3 = vld [vmem:[%s5845_s2] sm:$0xff]  ;;  %s47_s20 = smul.f32 0.5, %s5846_s0  ;;  %v4960_v30 = vstv %s5846_s0  ;;  %vm57_vm2 = vcmask 31744   ;;  %vm59_vm3 = vcmask 7168  }
   0x2   :  { %4181 = vmatpush3.msra.mxu0 %v4831_v1  ;;  %4191 = vmatprep.subr.mxu1 %v4775_v0  ;;  %v4851_v4 = vld [vmem:[%s5844_s3 + $0x8] sm:$0xff]  ;;  %4699 = vtanh.f32 %v4844_v3  ;;  %v4861_v5 = vld [vmem:[%s5844_s3] sm:$0xff]  ;;  %v140_v8 = vshrl.u32 %v139_v7, 7  ;;  %v4932_v26 = vld [vmem:[%s5848_s4 + $0x18] sm:$0xff]  ;;  %60 = vst.msk [vmem:[%s5852_s9] sm:$0xff] %vm59_vm3, %v4775_v0 }
   0x3   :  { %4182 = vmatprep.subr.mxu0 %v4775_v0  ;;  %4192 = vmatpush3.msra.mxu1 %v4831_v1  ;;  %v42_v9 = vld [vmem:[%s5847_s6] sm:$0x1]  ;;  %v4895_v10 = vstv %s47_s20  ;;  %v4937_v27 = vld [vmem:[%s5848_s4 + $0x10] sm:$0xff]  ;;  %v4944_v28 = vld [vmem:[%s5848_s4 + $0x8] sm:$0xff] }
   0x4   :  { %4183 = vmatpush3.msra.mxu0 %v4836_v2  ;;  %4193 = vmatprep.subr.mxu1 %v4775_v0  ;;  %v52_v11 = vmul.f32 %v4895_v10, %v42_v9  ;;  %v4898_v12 = vsub.s32 0, %v140_v8  ;;  %v4953_v29 = vld [vmem:[%s5848_s4] sm:$0xff]  ;;  %v54_v31 = vmul.f32 %v4960_v30, %v42_v9  ;;  %v4977_v47 = vld [vmem:[%s5849_s7 + $0x18] sm:$0xff]  ;;  %v4984_v52 = vld [vmem:[%s5849_s7 + $0x10] sm:$0xff] }
   0x5   :  { %4184 = vmatprep.subr.mxu0 %v4775_v0  ;;  %4194 = vmatpush3.msra.mxu1 %v4836_v2  ;;  %v4994_v55 = vld [vmem:[%s5849_s7 + $0x8] sm:$0xff]  ;;  %v5002_v58 = vld [vmem:[%s5849_s7] sm:$0xff] }
   0x6   :  { %4185 = vmatpush3.msra.mxu0 %v4851_v4  ;;  %4195 = vmatprep.subr.mxu1 %v4775_v0  ;;  %v4905_v15 = vrot.slane %v52_v11, %v4898_v12  ;;  %v4968_v34 = vrot.slane %v54_v31, %v4898_v12  ;;  %v55_v60 = vld [vmem:[%s5850_s1] sm:$0xff]  ;;  %s50_s1 = smul.f32 0.16666667, %s5846_s0 }
   0x7   :  { %4186 = vmatprep.subr.mxu0 %v4775_v0  ;;  %4196 = vmatpush3.msra.mxu1 %v4851_v4  ;;  %58 = vst.msk [vmem:[%s5851_s8] sm:$0xff] %vm57_vm2, %v55_v60  ;;  %v41_v63 = vld [vmem:[%s5853_s5] sm:$0x1] }
   0x8   :  { %4187 = vmatpush3.msra.mxu0 %v4861_v5  ;;  %4197 = vmatprep.subr.mxu1 %v4775_v0  ;;  %v479_v7 = vmul.f32 %v4960_v30, %v41_v63  ;;  %v5050_v9 = vstv %s50_s1 }
   0x9   :  { %4198 = vmatpush3.msra.mxu1 %v4861_v5  ;;  %4199 = vmatprep.mubr.msk.f32.mxu1 %vm4776_vm0, %v4775_v0 }
   0xa   :  { %4202 = vmatprep.subr.mxu0 %v4775_v0  ;;  %4213 = vmatprep.subr.mxu1 %v4775_v0 }
   0xf   :  { %v4875_v6 = vpop.eup %4699 }
  0x10   :  { %4189 = vmatmul.mubr.msk.f32.vlgmr.msra.gmra.mxu0 %vm62_vm1, %v4875_v6  ;;  %v391_v41 = vmul.f32 %v4875_v6, %v4875_v6 }
  0x11   :  { %4203 = vmatpush3.msra.mxu0 %v4831_v1  ;;  %4210 = vmatprep.mubr.msk.f32.mxu0 %vm4776_vm0, %v4775_v0 }
  0x12   :  { %4204 = vmatprep.subr.mxu0 %v4775_v0  ;;  %v392_v45 = vsub.f32 1.0, %v391_v41 }
  0x13   :  { %4205 = vmatpush3.msra.mxu0 %v4836_v2 }
  0x14   :  { %4206 = vmatprep.subr.mxu0 %v4775_v0 }
  0x15   :  { %4207 = vmatpush3.msra.mxu0 %v4851_v4 }
  0x16   :  { %4208 = vmatprep.subr.mxu0 %v4775_v0 }
  0x17   :  { %4209 = vmatpush3.msra.mxu0 %v4861_v5 }
  0x18   :  { %4224 = vmatprep.subr.mxu0 %v4775_v0 }
  0xd0   :  { %v4900_v13 = vpop.f32.mrf.mxu0 }
  0xd1   :  { %v136_v14 = vmul.f32 %v4900_v13, %v4895_v10 }
  0xd2   :  { %v4190_v16 = vpop.f32.mrf.mxu0 }
  0xd3   :  { %v137_v17 = vadd.f32 %v136_v14, %v4844_v3 }
  0xd5   :  { %v144_v18 = vadd.f32 %v4905_v15, %v137_v17 }
  0xd7   :  { %4701 = vtanh.f32 %v144_v18 }
  0xe4   :  { %v4702_v19 = vpop.eup %4701 }
  0xe5   :  { %4200 = vmatmul.mubr.msk.f32.vlgmr.msra.gmra.mxu1 %vm62_vm1, %v4702_v19  ;;  %v393_v38 = vmul.f32 %v4702_v19, %v4702_v19 }
  0xe6   :  { %4214 = vmatpush3.msra.mxu1 %v4831_v1  ;;  %4221 = vmatprep.mubr.msk.f32.mxu1 %vm4776_vm0, %v4775_v0 }
  0xe7   :  { %4215 = vmatprep.subr.mxu1 %v4775_v0  ;;  %v394_v42 = vsub.f32 1.0, %v393_v38 }
  0xe8   :  { %4216 = vmatpush3.msra.mxu1 %v4836_v2 }
  0xe9   :  { %4217 = vmatprep.subr.mxu1 %v4775_v0  ;;  %v395_v46 = vmul.f32 2.0, %v394_v42 }
  0xea   :  { %4218 = vmatpush3.msra.mxu1 %v4851_v4 }
  0xeb   :  { %4219 = vmatprep.subr.mxu1 %v4775_v0  ;;  %v396_v53 = vadd.f32 %v395_v46, %v392_v45 }
  0xec   :  { %4220 = vmatpush3.msra.mxu1 %v4861_v5 }
  0xed   :  { %4235 = vmatprep.subr.mxu1 %v4775_v0 }
 0x1a5   :  { %v4920_v20 = vpop.f32.mrf.mxu1 }
 0x1a6   :  { %v219_v21 = vmul.f32 %v4920_v20, %v4895_v10 }
 0x1a7   :  { %v4201_v22 = vpop.f32.mrf.mxu1 }
 0x1a8   :  { %v220_v23 = vadd.f32 %v219_v21, %v4844_v3 }
 0x1aa   :  { %v221_v24 = vadd.f32 %v220_v23, %v4905_v15 }
 0x1ac   :  { %4703 = vtanh.f32 %v221_v24 }
 0x1b9   :  { %v4704_v25 = vpop.eup %4703 }
 0x1ba   :  { %4211 = vmatmul.mubr.msk.f32.vlgmr.msra.gmra.mxu0 %vm62_vm1, %v4704_v25  ;;  %v387_v39 = vadd.f32 %v4704_v25, %v4702_v19  ;;  %v397_v40 = vmul.f32 %v4704_v25, %v4704_v25  ;;  %v5055_v19 = vrot.slane %v479_v7, %v4898_v12 }
 0x1bb   :  { %4232 = vmatprep.mubr.msk.f32.mxu0 %vm4776_vm0, %v4775_v0  ;;  %4225 = vmatpush3.msra.mxu0 %v4932_v26 }
 0x1bc   :  { %4226 = vmatprep.subr.mxu0 %v4775_v0  ;;  %v388_v43 = vmul.f32 2.0, %v387_v39  ;;  %v398_v44 = vsub.f32 1.0, %v397_v40 }
 0x1bd   :  { %4227 = vmatpush3.msra.mxu0 %v4937_v27 }
 0x1be   :  { %4228 = vmatprep.subr.mxu0 %v4775_v0  ;;  %v389_v48 = vadd.f32 %v4875_v6, %v388_v43  ;;  %v399_v49 = vmul.f32 2.0, %v398_v44 }
 0x1bf   :  { %4229 = vmatpush3.msra.mxu0 %v4944_v28 }
 0x1c0   :  { %4230 = vmatprep.subr.mxu0 %v4775_v0  ;;  %v400_v56 = vadd.f32 %v399_v49, %v396_v53 }
 0x1c1   :  { %4231 = vmatpush3.msra.mxu0 %v4953_v29 }
 0x1c2   :  { %4246 = vmatprep.subr.mxu0 %v4775_v0 }
 0x27a   :  { %v4963_v32 = vpop.f32.mrf.mxu0 }
 0x27b   :  { %v296_v33 = vmul.f32 %v4963_v32, %v4960_v30  ;;  %v379_v61 = vadd.f32 %v4963_v32, %v4920_v20 }
 0x27c   :  { %v4212_v35 = vpop.f32.mrf.mxu0 }
 0x27d   :  { %v297_v36 = vadd.f32 %v296_v33, %v4844_v3  ;;  %v380_v62 = vmul.f32 2.0, %v379_v61 }
 0x27f   :  { %v304_v37 = vadd.f32 %v4968_v34, %v297_v36  ;;  %v381_v6 = vadd.f32 %v380_v62, %v4900_v13 }
 0x281   :  { %4705 = vtanh.f32 %v304_v37 }
 0x28e   :  { %v4706_v50 = vpop.eup %4705 }
 0x28f   :  { %4222 = vmatmul.mubr.msk.f32.vlgmr.msra.gmra.mxu1 %vm62_vm1, %v4706_v50  ;;  %v390_v51 = vadd.f32 %v4706_v50, %v389_v48  ;;  %v401_v54 = vmul.f32 %v4706_v50, %v4706_v50 }
 0x290   :  { %4236 = vmatpush3.msra.mxu1 %v4977_v47  ;;  %4243 = vmatprep.mubr.msk.f32.mxu1 %vm4776_vm0, %v4775_v0 }
 0x291   :  { %4237 = vmatprep.subr.mxu1 %v4775_v0  ;;  %4233 = vmatmul.mubr.msk.f32.vlgmr.msra.gmra.mxu0 %vm62_vm1, %v390_v51  ;;  %v402_v57 = vsub.f32 1.0, %v401_v54 }
 0x292   :  { %4238 = vmatpush3.msra.mxu1 %v4984_v52  ;;  %4247 = vmatpush3.msra.mxu0 %v4831_v1 }
 0x293   :  { %4239 = vmatprep.subr.mxu1 %v4775_v0  ;;  %v403_v59 = vadd.f32 %v402_v57, %v400_v56  ;;  %4248 = vmatprep.subr.mxu0 %v4775_v0 }
 0x294   :  { %4240 = vmatpush3.msra.mxu1 %v4994_v55  ;;  %4249 = vmatpush3.msra.mxu0 %v4836_v2 }
 0x295   :  { %4241 = vmatprep.subr.mxu1 %v4775_v0  ;;  %4250 = vmatprep.subr.mxu0 %v4775_v0 }
 0x296   :  { %4242 = vmatpush3.msra.mxu1 %v5002_v58  ;;  %4251 = vmatpush3.msra.mxu0 %v4851_v4 }
 0x297   :  { %4244 = vmatmul.mubr.msk.f32.vlgmr.msra.gmra.mxu1 %vm62_vm1, %v403_v59  ;;  %4252 = vmatprep.subr.mxu0 %v4775_v0 }
 0x298   :  { %4253 = vmatpush3.msra.mxu0 %v4861_v5  ;;  %4254 = vmatprep.mubr.msk.f32.mxu0 %vm4776_vm0, %v4775_v0 }
 0x299   :  { %4257 = vmatprep.subr.mxu1 %v4775_v0  ;;  %4265 = vmatprep.mubr.msk.f32.mxu1 %vm4776_vm0, %v4775_v0 }
 0x29a   :  { %4258 = vmatpush3.msra.mxu1 %v4831_v1  ;;  %4268 = vmatprep.subr.mxu0 %v4775_v0 }
 0x29b   :  { %4259 = vmatprep.subr.mxu1 %v4775_v0 }
 0x29c   :  { %4260 = vmatpush3.msra.mxu1 %v4836_v2 }
 0x29d   :  { %4261 = vmatprep.subr.mxu1 %v4775_v0 }
 0x29e   :  { %4262 = vmatpush3.msra.mxu1 %v4851_v4 }
 0x29f   :  { %4263 = vmatprep.subr.mxu1 %v4775_v0 }
 0x2a0   :  { %4264 = vmatpush3.msra.mxu1 %v4861_v5 }
 0x2a1   :  { %4279 = vmatprep.subr.mxu1 %v4775_v0 }
 0x34f   :  { %v375_v8 = vpop.f32.mrf.mxu1 }
 0x350   :  { %v382_v11 = vadd.f32 %v381_v6, %v375_v8 }
 0x351   :  { %v4223_v14 = vpop.f32.mrf.mxu1  ;;  %v473_v16 = vpop.f32.mrf.mxu0 }
 0x352   :  { %v384_v17 = vmul.f32 %v5050_v9, %v382_v11  ;;  %v477_v18 = vmul.f32 %v473_v16, %v5050_v9 }
 0x353   :  { %v4234_v20 = vpop.f32.mrf.mxu0 }
 0x354   :  { %v385_v21 = vadd.f32 %v384_v17, %v4844_v3  ;;  %v478_v22 = vadd.f32 %v477_v18, %v55_v60 }
 0x356   :  { %v5059_v13 = vadd.f32 %v385_v21, %v4968_v34  ;;  %v5062_v23 = vadd.f32 %v5055_v19, %v478_v22 }
 0x357   :  { %v556_v24 = vpop.f32.mrf.mxu1 }
 0x358   :  { %4707 = vtanh.f32 %v5059_v13  ;;  %v5066_v25 = vmul.f32 %v556_v24, %v5050_v9  ;;  %3888 = vst.msk [vmem:[%s5851_s8 + $0x8] sm:$0xff] %vm57_vm2, %v5062_v23 }
 0x359   :  { %v4245_v3 = vpop.f32.mrf.mxu1 }
 0x35a   :  { %v561_v12 = vsub.f32 0.0, %v5066_v25 }
 0x35c   :  { %3889 = vst.msk [vmem:[%s5852_s9 + $0x8] sm:$0xff] %vm59_vm3, %v561_v12 }
 0x365   :  { %v4708_v31 = vpop.eup %4707 }
 0x366   :  { %4255 = vmatmul.mubr.msk.f32.vlgmr.msra.gmra.mxu0 %vm62_vm1, %v4708_v31  ;;  %v882_v59 = vmul.f32 %v4708_v31, %v4708_v31 }
 0x367   :  { %4269 = vmatpush3.msra.mxu0 %v4831_v1  ;;  %4276 = vmatprep.mubr.msk.f32.mxu0 %vm4776_vm0, %v4775_v0 }
 0x368   :  { %4270 = vmatprep.subr.mxu0 %v4775_v0  ;;  %v883_v63 = vsub.f32 1.0, %v882_v59 }
 0x369   :  { %4271 = vmatpush3.msra.mxu0 %v4836_v2 }
 0x36a   :  { %4272 = vmatprep.subr.mxu0 %v4775_v0 }
 0x36b   :  { %4273 = vmatpush3.msra.mxu0 %v4851_v4 }
 0x36c   :  { %4274 = vmatprep.subr.mxu0 %v4775_v0 }
 0x36d   :  { %4275 = vmatpush3.msra.mxu0 %v4861_v5 }
 0x36e   :  { %4290 = vmatprep.subr.mxu0 %v4775_v0 }
 0x426   :  { %v5091_v32 = vpop.f32.mrf.mxu0 }
 0x427   :  { %v640_v33 = vmul.f32 %v5091_v32, %v4895_v10 }
 0x428   :  { %v4256_v35 = vpop.f32.mrf.mxu0 }
 0x429   :  { %v641_v36 = vadd.f32 %v640_v33, %v5059_v13 }
 0x42b   :  { %v642_v37 = vadd.f32 %v641_v36, %v4905_v15 }
 0x42d   :  { %4709 = vtanh.f32 %v642_v37 }
 0x43a   :  { %v4710_v38 = vpop.eup %4709 }
 0x43b   :  { %4266 = vmatmul.mubr.msk.f32.vlgmr.msra.gmra.mxu1 %vm62_vm1, %v4710_v38  ;;  %v884_v51 = vmul.f32 %v4710_v38, %v4710_v38 }
 0x43c   :  { %4280 = vmatpush3.msra.mxu1 %v4831_v1  ;;  %4287 = vmatprep.mubr.msk.f32.mxu1 %vm4776_vm0, %v4775_v0 }
 0x43d   :  { %4281 = vmatprep.subr.mxu1 %v4775_v0  ;;  %v885_v56 = vsub.f32 1.0, %v884_v51 }
 0x43e   :  { %4282 = vmatpush3.msra.mxu1 %v4836_v2 }
 0x43f   :  { %4283 = vmatprep.subr.mxu1 %v4775_v0  ;;  %v886_v61 = vmul.f32 2.0, %v885_v56 }
 0x440   :  { %4284 = vmatpush3.msra.mxu1 %v4851_v4 }
 0x441   :  { %4285 = vmatprep.subr.mxu1 %v4775_v0  ;;  %v887_v11 = vadd.f32 %v886_v61, %v883_v63 }
 0x442   :  { %4286 = vmatpush3.msra.mxu1 %v4861_v5 }
 0x443   :  { %4301 = vmatprep.subr.mxu1 %v4775_v0 }
 0x4fb   :  { %v5108_v39 = vpop.f32.mrf.mxu1 }
 0x4fc   :  { %v717_v40 = vmul.f32 %v5108_v39, %v4895_v10 }
 0x4fd   :  { %v4267_v41 = vpop.f32.mrf.mxu1 }
 0x4fe   :  { %v718_v42 = vadd.f32 %v717_v40, %v5059_v13 }
 0x500   :  { %v719_v43 = vadd.f32 %v718_v42, %v4905_v15 }
 0x502   :  { %4711 = vtanh.f32 %v719_v43 }
 0x50f   :  { %v4712_v44 = vpop.eup %4711 }
 0x510   :  { %4277 = vmatmul.mubr.msk.f32.vlgmr.msra.gmra.mxu0 %vm62_vm1, %v4712_v44  ;;  %v878_v53 = vadd.f32 %v4712_v44, %v4710_v38  ;;  %v888_v54 = vmul.f32 %v4712_v44, %v4712_v44 }
 0x511   :  { %4291 = vmatpush3.msra.mxu0 %v4932_v26  ;;  %4298 = vmatprep.mubr.msk.f32.mxu0 %vm4776_vm0, %v4775_v0 }
 0x512   :  { %4292 = vmatprep.subr.mxu0 %v4775_v0  ;;  %v879_v57 = vmul.f32 2.0, %v878_v53  ;;  %v889_v60 = vsub.f32 1.0, %v888_v54 }
 0x513   :  { %4293 = vmatpush3.msra.mxu0 %v4937_v27 }
 0x514   :  { %4294 = vmatprep.subr.mxu0 %v4775_v0  ;;  %v880_v62 = vadd.f32 %v4708_v31, %v879_v57  ;;  %v890_v6 = vmul.f32 2.0, %v889_v60 }
 0x515   :  { %4295 = vmatpush3.msra.mxu0 %v4944_v28 }
 0x516   :  { %4296 = vmatprep.subr.mxu0 %v4775_v0  ;;  %v891_v16 = vadd.f32 %v890_v6, %v887_v11 }
 0x517   :  { %4297 = vmatpush3.msra.mxu0 %v4953_v29 }
 0x518   :  { %4312 = vmatprep.subr.mxu0 %v4775_v0 }
 0x5d0   :  { %v790_v45 = vpop.f32.mrf.mxu0 }
 0x5d1   :  { %v794_v46 = vmul.f32 %v790_v45, %v4960_v30  ;;  %v871_v20 = vadd.f32 %v790_v45, %v5108_v39 }
 0x5d2   :  { %v4278_v48 = vpop.f32.mrf.mxu0 }
 0x5d3   :  { %v795_v49 = vadd.f32 %v794_v46, %v5059_v13  ;;  %v872_v21 = vmul.f32 2.0, %v871_v20 }
 0x5d5   :  { %v796_v50 = vadd.f32 %v795_v49, %v4968_v34  ;;  %v873_v22 = vadd.f32 %v872_v21, %v5091_v32 }
 0x5d7   :  { %4713 = vtanh.f32 %v796_v50 }
 0x5e4   :  { %v4714_v7 = vpop.eup %4713 }
 0x5e5   :  { %4288 = vmatmul.mubr.msk.f32.vlgmr.msra.gmra.mxu1 %vm62_vm1, %v4714_v7  ;;  %v881_v8 = vadd.f32 %v4714_v7, %v880_v62  ;;  %v892_v14 = vmul.f32 %v4714_v7, %v4714_v7 }
 0x5e6   :  { %4302 = vmatpush3.msra.mxu1 %v4977_v47  ;;  %4309 = vmatprep.mubr.msk.f32.mxu1 %vm4776_vm0, %v4775_v0 }
 0x5e7   :  { %4303 = vmatprep.subr.mxu1 %v4775_v0  ;;  %4299 = vmatmul.mubr.msk.f32.vlgmr.msra.gmra.mxu0 %vm62_vm1, %v881_v8  ;;  %v893_v17 = vsub.f32 1.0, %v892_v14 }
 0x5e8   :  { %4304 = vmatpush3.msra.mxu1 %v4984_v52  ;;  %4313 = vmatpush3.msra.mxu0 %v4831_v1 }
 0x5e9   :  { %4305 = vmatprep.subr.mxu1 %v4775_v0  ;;  %v894_v18 = vadd.f32 %v893_v17, %v891_v16  ;;  %4314 = vmatprep.subr.mxu0 %v4775_v0 }
 0x5ea   :  { %4306 = vmatpush3.msra.mxu1 %v4994_v55  ;;  %4315 = vmatpush3.msra.mxu0 %v4836_v2 }
 0x5eb   :  { %4307 = vmatprep.subr.mxu1 %v4775_v0  ;;  %4316 = vmatprep.subr.mxu0 %v4775_v0 }
 0x5ec   :  { %4308 = vmatpush3.msra.mxu1 %v5002_v58  ;;  %4317 = vmatpush3.msra.mxu0 %v4851_v4 }
 0x5ed   :  { %4310 = vmatmul.mubr.msk.f32.vlgmr.msra.gmra.mxu1 %vm62_vm1, %v894_v18  ;;  %4318 = vmatprep.subr.mxu0 %v4775_v0 }
 0x5ee   :  { %4319 = vmatpush3.msra.mxu0 %v4861_v5  ;;  %4320 = vmatprep.mubr.msk.f32.mxu0 %vm4776_vm0, %v4775_v0 }
 0x5ef   :  { %4323 = vmatprep.subr.mxu1 %v4775_v0  ;;  %4331 = vmatprep.mubr.msk.f32.mxu1 %vm4776_vm0, %v4775_v0 }
 0x5f0   :  { %4324 = vmatpush3.msra.mxu1 %v4831_v1  ;;  %4334 = vmatprep.subr.mxu0 %v4775_v0 }
 0x5f1   :  { %4325 = vmatprep.subr.mxu1 %v4775_v0 }
 0x5f2   :  { %4326 = vmatpush3.msra.mxu1 %v4836_v2 }
 0x5f3   :  { %4327 = vmatprep.subr.mxu1 %v4775_v0 }
 0x5f4   :  { %4328 = vmatpush3.msra.mxu1 %v4851_v4 }
 0x5f5   :  { %4329 = vmatprep.subr.mxu1 %v4775_v0 }
 0x5f6   :  { %4330 = vmatpush3.msra.mxu1 %v4861_v5 }
 0x5f7   :  { %4345 = vmatprep.subr.mxu1 %v4775_v0 }
 0x6a5   :  { %v867_v24 = vpop.f32.mrf.mxu1 }
 0x6a6   :  { %v874_v3 = vadd.f32 %v873_v22, %v867_v24 }
 0x6a7   :  { %v4289_v31 = vpop.f32.mrf.mxu1  ;;  %v964_v33 = vpop.f32.mrf.mxu0 }
 0x6a8   :  { %v875_v35 = vmul.f32 %v874_v3, %v5050_v9  ;;  %v968_v36 = vmul.f32 %v964_v33, %v5050_v9 }
 0x6a9   :  { %v4300_v37 = vpop.f32.mrf.mxu0 }
 0x6aa   :  { %v876_v38 = vadd.f32 %v875_v35, %v5059_v13  ;;  %v969_v40 = vadd.f32 %v968_v36, %v5062_v23 }
 0x6ac   :  { %v5168_v41 = vadd.f32 %v876_v38, %v4968_v34  ;;  %v5171_v39 = vadd.f32 %v969_v40, %v5055_v19 }
 0x6ad   :  { %v1040_v32 = vpop.f32.mrf.mxu1 }
 0x6ae   :  { %4715 = vtanh.f32 %v5168_v41  ;;  %v1044_v42 = vmul.f32 %v1040_v32, %v5050_v9  ;;  %3896 = vst.msk [vmem:[%s5851_s8 + $0x10] sm:$0xff] %vm57_vm2, %v5171_v39 }
 0x6af   :  { %v4311_v13 = vpop.f32.mrf.mxu1 }
 0x6b0   :  { %v5182_v23 = vsub.f32 %v561_v12, %v1044_v42 }
 0x6b2   :  { %3897 = vst.msk [vmem:[%s5852_s9 + $0x10] sm:$0xff] %vm59_vm3, %v5182_v23 }
 0x6bb   :  { %v4716_v43 = vpop.eup %4715 }
 0x6bc   :  { %4321 = vmatmul.mubr.msk.f32.vlgmr.msra.gmra.mxu0 %vm62_vm1, %v4716_v43  ;;  %v1366_v14 = vmul.f32 %v4716_v43, %v4716_v43 }
 0x6bd   :  { %4335 = vmatpush3.msra.mxu0 %v4831_v1  ;;  %4342 = vmatprep.mubr.msk.f32.mxu0 %vm4776_vm0, %v4775_v0 }
 0x6be   :  { %4336 = vmatprep.subr.mxu0 %v4775_v0  ;;  %v1367_v20 = vsub.f32 1.0, %v1366_v14 }
 0x6bf   :  { %4337 = vmatpush3.msra.mxu0 %v4836_v2 }
 0x6c0   :  { %4338 = vmatprep.subr.mxu0 %v4775_v0 }
 0x6c1   :  { %4339 = vmatpush3.msra.mxu0 %v4851_v4 }
 0x6c2   :  { %4340 = vmatprep.subr.mxu0 %v4775_v0 }
 0x6c3   :  { %4341 = vmatpush3.msra.mxu0 %v4861_v5 }
 0x6c4   :  { %4356 = vmatprep.subr.mxu0 %v4775_v0 }
 0x77c   :  { %v5200_v25 = vpop.f32.mrf.mxu0 }
 0x77d   :  { %v1124_v12 = vmul.f32 %v5200_v25, %v4895_v10 }
 0x77e   :  { %v4322_v44 = vpop.f32.mrf.mxu0 }
 0x77f   :  { %v1125_v45 = vadd.f32 %v1124_v12, %v5168_v41 }
 0x781   :  { %v1126_v46 = vadd.f32 %v1125_v45, %v4905_v15 }
 0x783   :  { %4717 = vtanh.f32 %v1126_v46 }
 0x790   :  { %v4718_v48 = vpop.eup %4717 }
 0x791   :  { %4332 = vmatmul.mubr.msk.f32.vlgmr.msra.gmra.mxu1 %vm62_vm1, %v4718_v48  ;;  %v1368_v63 = vmul.f32 %v4718_v48, %v4718_v48 }
 0x792   :  { %4346 = vmatpush3.msra.mxu1 %v4831_v1  ;;  %4353 = vmatprep.mubr.msk.f32.mxu1 %vm4776_vm0, %v4775_v0 }
 0x793   :  { %4347 = vmatprep.subr.mxu1 %v4775_v0  ;;  %v1369_v8 = vsub.f32 1.0, %v1368_v63 }
 0x794   :  { %4348 = vmatpush3.msra.mxu1 %v4836_v2 }
 0x795   :  { %4349 = vmatprep.subr.mxu1 %v4775_v0  ;;  %v1370_v17 = vmul.f32 2.0, %v1369_v8 }
 0x796   :  { %4350 = vmatpush3.msra.mxu1 %v4851_v4 }
 0x797   :  { %4351 = vmatprep.subr.mxu1 %v4775_v0  ;;  %v1371_v3 = vadd.f32 %v1370_v17, %v1367_v20 }
 0x798   :  { %4352 = vmatpush3.msra.mxu1 %v4861_v5 }
 0x799   :  { %4367 = vmatprep.subr.mxu1 %v4775_v0 }
 0x851   :  { %v5217_v49 = vpop.f32.mrf.mxu1 }
 0x852   :  { %v1201_v50 = vmul.f32 %v5217_v49, %v4895_v10 }
 0x853   :  { %v4333_v51 = vpop.f32.mrf.mxu1 }
 0x854   :  { %v1202_v53 = vadd.f32 %v1201_v50, %v5168_v41 }
 0x856   :  { %v1203_v54 = vadd.f32 %v1202_v53, %v4905_v15 }
 0x858   :  { %4719 = vtanh.f32 %v1203_v54 }
 0x865   :  { %v4720_v56 = vpop.eup %4719 }
 0x866   :  { %4343 = vmatmul.mubr.msk.f32.vlgmr.msra.gmra.mxu0 %vm62_vm1, %v4720_v56  ;;  %v1362_v6 = vadd.f32 %v4720_v56, %v4718_v48  ;;  %v1372_v7 = vmul.f32 %v4720_v56, %v4720_v56 }
 0x867   :  { %4357 = vmatpush3.msra.mxu0 %v4932_v26  ;;  %4364 = vmatprep.mubr.msk.f32.mxu0 %vm4776_vm0, %v4775_v0 }
 0x868   :  { %4358 = vmatprep.subr.mxu0 %v4775_v0  ;;  %v1363_v11 = vmul.f32 2.0, %v1362_v6  ;;  %v1373_v16 = vsub.f32 1.0, %v1372_v7 }
 0x869   :  { %4359 = vmatpush3.msra.mxu0 %v4937_v27 }
 0x86a   :  { %4360 = vmatprep.subr.mxu0 %v4775_v0  ;;  %v1364_v18 = vadd.f32 %v4716_v43, %v1363_v11  ;;  %v1374_v21 = vmul.f32 2.0, %v1373_v16 }
 0x86b   :  { %4361 = vmatpush3.msra.mxu0 %v4944_v28 }
 0x86c   :  { %4362 = vmatprep.subr.mxu0 %v4775_v0  ;;  %v1375_v33 = vadd.f32 %v1374_v21, %v1371_v3 }
 0x86d   :  { %4363 = vmatpush3.msra.mxu0 %v4953_v29 }
 0x86e   :  { %4378 = vmatprep.subr.mxu0 %v4775_v0 }
 0x926   :  { %v1274_v57 = vpop.f32.mrf.mxu0 }
 0x927   :  { %v1278_v59 = vmul.f32 %v1274_v57, %v4960_v30  ;;  %v1355_v37 = vadd.f32 %v1274_v57, %v5217_v49 }
 0x928   :  { %v4344_v60 = vpop.f32.mrf.mxu0 }
 0x929   :  { %v1279_v61 = vadd.f32 %v1278_v59, %v5168_v41  ;;  %v1356_v38 = vmul.f32 2.0, %v1355_v37 }
 0x92b   :  { %v1280_v62 = vadd.f32 %v1279_v61, %v4968_v34  ;;  %v1357_v40 = vadd.f32 %v1356_v38, %v5200_v25 }
 0x92d   :  { %4721 = vtanh.f32 %v1280_v62 }
 0x93a   :  { %v4722_v22 = vpop.eup %4721 }
 0x93b   :  { %4354 = vmatmul.mubr.msk.f32.vlgmr.msra.gmra.mxu1 %vm62_vm1, %v4722_v22  ;;  %v1365_v24 = vadd.f32 %v4722_v22, %v1364_v18  ;;  %v1376_v31 = vmul.f32 %v4722_v22, %v4722_v22 }
 0x93c   :  { %4368 = vmatpush3.msra.mxu1 %v4977_v47  ;;  %4375 = vmatprep.mubr.msk.f32.mxu1 %vm4776_vm0, %v4775_v0 }
 0x93d   :  { %4369 = vmatprep.subr.mxu1 %v4775_v0  ;;  %4365 = vmatmul.mubr.msk.f32.vlgmr.msra.gmra.mxu0 %vm62_vm1, %v1365_v24  ;;  %v1377_v35 = vsub.f32 1.0, %v1376_v31 }
 0x93e   :  { %4370 = vmatpush3.msra.mxu1 %v4984_v52  ;;  %4379 = vmatpush3.msra.mxu0 %v4831_v1 }
 0x93f   :  { %4371 = vmatprep.subr.mxu1 %v4775_v0  ;;  %v1378_v36 = vadd.f32 %v1377_v35, %v1375_v33  ;;  %4380 = vmatprep.subr.mxu0 %v4775_v0 }
 0x940   :  { %4372 = vmatpush3.msra.mxu1 %v4994_v55  ;;  %4381 = vmatpush3.msra.mxu0 %v4836_v2 }
 0x941   :  { %4373 = vmatprep.subr.mxu1 %v4775_v0  ;;  %4382 = vmatprep.subr.mxu0 %v4775_v0 }
 0x942   :  { %4374 = vmatpush3.msra.mxu1 %v5002_v58  ;;  %4383 = vmatpush3.msra.mxu0 %v4851_v4 }
 0x943   :  { %4376 = vmatmul.mubr.msk.f32.vlgmr.msra.gmra.mxu1 %vm62_vm1, %v1378_v36  ;;  %4384 = vmatprep.subr.mxu0 %v4775_v0 }
 0x944   :  { %4385 = vmatpush3.msra.mxu0 %v4861_v5  ;;  %4386 = vmatprep.mubr.msk.f32.mxu0 %vm4776_vm0, %v4775_v0 }
 0x945   :  { %4389 = vmatprep.subr.mxu1 %v4775_v0  ;;  %4397 = vmatprep.mubr.msk.f32.mxu1 %vm4776_vm0, %v4775_v0 }
 0x946   :  { %4390 = vmatpush3.msra.mxu1 %v4831_v1  ;;  %4400 = vmatprep.subr.mxu0 %v4775_v0 }
 0x947   :  { %4391 = vmatprep.subr.mxu1 %v4775_v0 }
 0x948   :  { %4392 = vmatpush3.msra.mxu1 %v4836_v2 }
 0x949   :  { %4393 = vmatprep.subr.mxu1 %v4775_v0 }
 0x94a   :  { %4394 = vmatpush3.msra.mxu1 %v4851_v4 }
 0x94b   :  { %4395 = vmatprep.subr.mxu1 %v4775_v0 }
 0x94c   :  { %4396 = vmatpush3.msra.mxu1 %v4861_v5 }
 0x94d   :  { %4411 = vmatprep.subr.mxu1 %v4775_v0 }
 0x9fb   :  { %v1351_v32 = vpop.f32.mrf.mxu1 }
 0x9fc   :  { %v1358_v42 = vadd.f32 %v1357_v40, %v1351_v32 }
 0x9fd   :  { %v4355_v13 = vpop.f32.mrf.mxu1  ;;  %v1448_v43 = vpop.f32.mrf.mxu0 }
 0x9fe   :  { %v1359_v12 = vmul.f32 %v1358_v42, %v5050_v9  ;;  %v1452_v44 = vmul.f32 %v1448_v43, %v5050_v9 }
 0x9ff   :  { %v4366_v45 = vpop.f32.mrf.mxu0 }
 0xa00   :  { %v1360_v46 = vadd.f32 %v1359_v12, %v5168_v41  ;;  %v1453_v48 = vadd.f32 %v1452_v44, %v5171_v39 }
 0xa02   :  { %v5277_v50 = vadd.f32 %v1360_v46, %v4968_v34  ;;  %v5280_v49 = vadd.f32 %v1453_v48, %v5055_v19 }
 0xa03   :  { %v1524_v25 = vpop.f32.mrf.mxu1 }
 0xa04   :  { %4723 = vtanh.f32 %v5277_v50  ;;  %v1528_v51 = vmul.f32 %v1524_v25, %v5050_v9  ;;  %3904 = vst.msk [vmem:[%s5851_s8 + $0x18] sm:$0xff] %vm57_vm2, %v5280_v49 }
 0xa05   :  { %v4377_v41 = vpop.f32.mrf.mxu1 }
 0xa06   :  { %v5290_v39 = vsub.f32 %v5182_v23, %v1528_v51 }
 0xa08   :  { %3905 = vst.msk [vmem:[%s5852_s9 + $0x18] sm:$0xff] %vm59_vm3, %v5290_v39 }
 0xa11   :  { %v4724_v53 = vpop.eup %4723 }
 0xa12   :  { %4387 = vmatmul.mubr.msk.f32.vlgmr.msra.gmra.mxu0 %vm62_vm1, %v4724_v53  ;;  %v1850_v31 = vmul.f32 %v4724_v53, %v4724_v53 }
 0xa13   :  { %4401 = vmatpush3.msra.mxu0 %v4831_v1  ;;  %4408 = vmatprep.mubr.msk.f32.mxu0 %vm4776_vm0, %v4775_v0 }
 0xa14   :  { %4402 = vmatprep.subr.mxu0 %v4775_v0  ;;  %v1851_v37 = vsub.f32 1.0, %v1850_v31 }
 0xa15   :  { %4403 = vmatpush3.msra.mxu0 %v4836_v2 }
 0xa16   :  { %4404 = vmatprep.subr.mxu0 %v4775_v0 }
 0xa17   :  { %4405 = vmatpush3.msra.mxu0 %v4851_v4 }
 0xa18   :  { %4406 = vmatprep.subr.mxu0 %v4775_v0 }
 0xa19   :  { %4407 = vmatpush3.msra.mxu0 %v4861_v5 }
 0xa1a   :  { %4422 = vmatprep.subr.mxu0 %v4775_v0 }
 0xad2   :  { %v5308_v23 = vpop.f32.mrf.mxu0 }
 0xad3   :  { %v1608_v54 = vmul.f32 %v5308_v23, %v4895_v10 }
 0xad4   :  { %v4388_v56 = vpop.f32.mrf.mxu0 }
 0xad5   :  { %v1609_v57 = vadd.f32 %v1608_v54, %v5277_v50 }
 0xad7   :  { %v1610_v59 = vadd.f32 %v1609_v57, %v4905_v15 }
 0xad9   :  { %4725 = vtanh.f32 %v1610_v59 }
 0xae6   :  { %v4726_v60 = vpop.eup %4725 }
 0xae7   :  { %4398 = vmatmul.mubr.msk.f32.vlgmr.msra.gmra.mxu1 %vm62_vm1, %v4726_v60  ;;  %v1852_v20 = vmul.f32 %v4726_v60, %v4726_v60 }
 0xae8   :  { %4412 = vmatpush3.msra.mxu1 %v4831_v1  ;;  %4419 = vmatprep.mubr.msk.f32.mxu1 %vm4776_vm0, %v4775_v0 }
 0xae9   :  { %4413 = vmatprep.subr.mxu1 %v4775_v0  ;;  %v1853_v24 = vsub.f32 1.0, %v1852_v20 }
 0xaea   :  { %4414 = vmatpush3.msra.mxu1 %v4836_v2 }
 0xaeb   :  { %4415 = vmatprep.subr.mxu1 %v4775_v0  ;;  %v1854_v35 = vmul.f32 2.0, %v1853_v24 }
 0xaec   :  { %4416 = vmatpush3.msra.mxu1 %v4851_v4 }
 0xaed   :  { %4417 = vmatprep.subr.mxu1 %v4775_v0  ;;  %v1855_v42 = vadd.f32 %v1854_v35, %v1851_v37 }
 0xaee   :  { %4418 = vmatpush3.msra.mxu1 %v4861_v5 }
 0xaef   :  { %4433 = vmatprep.subr.mxu1 %v4775_v0 }
 0xba7   :  { %v5325_v61 = vpop.f32.mrf.mxu1 }
 0xba8   :  { %v1685_v62 = vmul.f32 %v5325_v61, %v4895_v10 }
 0xba9   :  { %v4399_v63 = vpop.f32.mrf.mxu1 }
 0xbaa   :  { %v1686_v6 = vadd.f32 %v1685_v62, %v5277_v50  ;;  %v5432_v63 = vld [vmem:[%s5844_s3] sm:$0xff] }
 0xbac   :  { %v1687_v7 = vadd.f32 %v1686_v6, %v4905_v15 }
 0xbae   :  { %4727 = vtanh.f32 %v1687_v7 }
 0xbbb   :  { %v4728_v8 = vpop.eup %4727 }
 0xbbc   :  { %4409 = vmatmul.mubr.msk.f32.vlgmr.msra.gmra.mxu0 %vm62_vm1, %v4728_v8  ;;  %v1846_v21 = vadd.f32 %v4728_v8, %v4726_v60  ;;  %v1856_v22 = vmul.f32 %v4728_v8, %v4728_v8 }
 0xbbd   :  { %4423 = vmatpush3.msra.mxu0 %v4932_v26  ;;  %4430 = vmatprep.mubr.msk.f32.mxu0 %vm4776_vm0, %v4775_v0 }
 0xbbe   :  { %4424 = vmatprep.subr.mxu0 %v4775_v0  ;;  %v1847_v3 = vmul.f32 2.0, %v1846_v21  ;;  %v1857_v33 = vsub.f32 1.0, %v1856_v22 }
 0xbbf   :  { %4425 = vmatpush3.msra.mxu0 %v4937_v27 }
 0xbc0   :  { %4426 = vmatprep.subr.mxu0 %v4775_v0  ;;  %v1848_v36 = vadd.f32 %v4724_v53, %v1847_v3  ;;  %v1858_v38 = vmul.f32 2.0, %v1857_v33 }
 0xbc1   :  { %4427 = vmatpush3.msra.mxu0 %v4944_v28 }
 0xbc2   :  { %4428 = vmatprep.subr.mxu0 %v4775_v0  ;;  %v1859_v43 = vadd.f32 %v1858_v38, %v1855_v42 }
 0xbc3   :  { %4429 = vmatpush3.msra.mxu0 %v4953_v29 }
 0xbc4   :  { %4444 = vmatprep.subr.mxu0 %v4775_v0 }
 0xc7c   :  { %v1758_v11 = vpop.f32.mrf.mxu0 }
 0xc7d   :  { %v1762_v14 = vmul.f32 %v1758_v11, %v4960_v30  ;;  %v1839_v45 = vadd.f32 %v1758_v11, %v5325_v61 }
 0xc7e   :  { %v4410_v16 = vpop.f32.mrf.mxu0 }
 0xc7f   :  { %v1763_v17 = vadd.f32 %v1762_v14, %v5277_v50  ;;  %v1840_v46 = vmul.f32 2.0, %v1839_v45 }
 0xc81   :  { %v1764_v18 = vadd.f32 %v1763_v17, %v4968_v34  ;;  %v1841_v48 = vadd.f32 %v1840_v46, %v5308_v23 }
 0xc83   :  { %4729 = vtanh.f32 %v1764_v18 }
 0xc90   :  { %v4730_v40 = vpop.eup %4729 }
 0xc91   :  { %4420 = vmatmul.mubr.msk.f32.vlgmr.msra.gmra.mxu1 %vm62_vm1, %v4730_v40  ;;  %v1849_v32 = vadd.f32 %v4730_v40, %v1848_v36  ;;  %v1860_v13 = vmul.f32 %v4730_v40, %v4730_v40 }
 0xc92   :  { %4434 = vmatpush3.msra.mxu1 %v4977_v47  ;;  %4441 = vmatprep.mubr.msk.f32.mxu1 %vm4776_vm0, %v4775_v0 }
 0xc93   :  { %4435 = vmatprep.subr.mxu1 %v4775_v0  ;;  %4431 = vmatmul.mubr.msk.f32.vlgmr.msra.gmra.mxu0 %vm62_vm1, %v1849_v32  ;;  %v1861_v12 = vsub.f32 1.0, %v1860_v13 }
 0xc94   :  { %4436 = vmatpush3.msra.mxu1 %v4984_v52  ;;  %4445 = vmatpush3.msra.mxu0 %v4831_v1  ;;  %v5372_v1 = vld [vmem:[%s5844_s3 + $0x18] sm:$0xff] }
 0xc95   :  { %4437 = vmatprep.subr.mxu1 %v4775_v0  ;;  %v1862_v44 = vadd.f32 %v1861_v12, %v1859_v43  ;;  %4446 = vmatprep.subr.mxu0 %v4775_v0 }
 0xc96   :  { %4438 = vmatpush3.msra.mxu1 %v4994_v55  ;;  %4447 = vmatpush3.msra.mxu0 %v4836_v2  ;;  %v5380_v2 = vld [vmem:[%s5844_s3 + $0x10] sm:$0xff] }
 0xc97   :  { %4439 = vmatprep.subr.mxu1 %v4775_v0  ;;  %4448 = vmatprep.subr.mxu0 %v4775_v0 }
 0xc98   :  { %4440 = vmatpush3.msra.mxu1 %v5002_v58  ;;  %4449 = vmatpush3.msra.mxu0 %v4851_v4 }
 0xc99   :  { %4442 = vmatmul.mubr.msk.f32.vlgmr.msra.gmra.mxu1 %vm62_vm1, %v1862_v44  ;;  %4450 = vmatprep.subr.mxu0 %v4775_v0 }
 0xc9a   :  { %4451 = vmatpush3.msra.mxu0 %v4861_v5  ;;  %4452 = vmatprep.mubr.msk.f32.mxu0 %vm4776_vm0, %v4775_v0 }
 0xc9b   :  { %4455 = vmatprep.subr.mxu1 %v4775_v0  ;;  %4463 = vmatprep.mubr.msk.f32.mxu1 %vm4776_vm0, %v4775_v0 }
 0xc9c   :  { %4456 = vmatpush3.msra.mxu1 %v5372_v1  ;;  %4466 = vmatprep.subr.mxu0 %v4775_v0 }
 0xc9d   :  { %4457 = vmatprep.subr.mxu1 %v4775_v0 }
 0xc9e   :  { %4458 = vmatpush3.msra.mxu1 %v5380_v2 }
 0xc9f   :  { %4459 = vmatprep.subr.mxu1 %v4775_v0 }
 0xca0   :  { %4460 = vmatpush3.msra.mxu1 %v4851_v4 }
 0xca1   :  { %4461 = vmatprep.subr.mxu1 %v4775_v0 }
 0xca2   :  { %4462 = vmatpush3.msra.mxu1 %v4861_v5 }
 0xca3   :  { %4477 = vmatprep.subr.mxu1 %v4775_v0 }
 0xd51   :  { %v1835_v25 = vpop.f32.mrf.mxu1 }
 0xd52   :  { %v1842_v51 = vadd.f32 %v1841_v48, %v1835_v25 }
 0xd53   :  { %v4421_v41 = vpop.f32.mrf.mxu1  ;;  %v1932_v53 = vpop.f32.mrf.mxu0 }
 0xd54   :  { %v1843_v54 = vmul.f32 %v1842_v51, %v5050_v9  ;;  %v1936_v56 = vmul.f32 %v1932_v53, %v5050_v9 }
 0xd55   :  { %v4432_v4 = vpop.f32.mrf.mxu0 }
 0xd56   :  { %v1844_v57 = vadd.f32 %v1843_v54, %v5277_v50  ;;  %v1937_v5 = vadd.f32 %v1936_v56, %v5280_v49 }
 0xd58   :  { %v5395_v59 = vadd.f32 %v1844_v57, %v4968_v34  ;;  %v5398_v60 = vadd.f32 %v1937_v5, %v5055_v19 }
 0xd59   :  { %v2008_v23 = vpop.f32.mrf.mxu1 }
 0xd5a   :  { %4731 = vtanh.f32 %v5395_v59  ;;  %v2012_v61 = vmul.f32 %v2008_v23, %v5050_v9  ;;  %3912 = vst.msk [vmem:[%s5851_s8 + $0x20] sm:$0xff] %vm57_vm2, %v5398_v60 }
 0xd5b   :  { %v4443_v50 = vpop.f32.mrf.mxu1 }
 0xd5c   :  { %v5408_v49 = vsub.f32 %v5290_v39, %v2012_v61  ;;  %v5425_v39 = vld [vmem:[%s5844_s3 + $0x8] sm:$0xff] }
 0xd5e   :  { %3913 = vst.msk [vmem:[%s5852_s9 + $0x20] sm:$0xff] %vm59_vm3, %v5408_v49 }
 0xd67   :  { %v4732_v62 = vpop.eup %4731 }
 0xd68   :  { %4453 = vmatmul.mubr.msk.f32.vlgmr.msra.gmra.mxu0 %vm62_vm1, %v4732_v62  ;;  %v2334_v40 = vmul.f32 %v4732_v62, %v4732_v62 }
 0xd69   :  { %4467 = vmatpush3.msra.mxu0 %v5372_v1  ;;  %4474 = vmatprep.mubr.msk.f32.mxu0 %vm4776_vm0, %v4775_v0 }
 0xd6a   :  { %4468 = vmatprep.subr.mxu0 %v4775_v0  ;;  %v2335_v13 = vsub.f32 1.0, %v2334_v40 }
 0xd6b   :  { %4469 = vmatpush3.msra.mxu0 %v5380_v2 }
 0xd6c   :  { %4470 = vmatprep.subr.mxu0 %v4775_v0 }
 0xd6d   :  { %4471 = vmatpush3.msra.mxu0 %v5425_v39 }
 0xd6e   :  { %4472 = vmatprep.subr.mxu0 %v4775_v0 }
 0xd6f   :  { %4473 = vmatpush3.msra.mxu0 %v5432_v63 }
 0xd70   :  { %4488 = vmatprep.subr.mxu0 %v4775_v0 }
 0xe28   :  { %v5436_v6 = vpop.f32.mrf.mxu0 }
 0xe29   :  { %v2092_v7 = vmul.f32 %v5436_v6, %v4895_v10 }
 0xe2a   :  { %v4454_v8 = vpop.f32.mrf.mxu0 }
 0xe2b   :  { %v2093_v11 = vadd.f32 %v2092_v7, %v5395_v59 }
 0xe2d   :  { %v2094_v14 = vadd.f32 %v2093_v11, %v4905_v15 }
 0xe2f   :  { %4733 = vtanh.f32 %v2094_v14 }
 0xe3c   :  { %v4734_v16 = vpop.eup %4733 }
 0xe3d   :  { %4464 = vmatmul.mubr.msk.f32.vlgmr.msra.gmra.mxu1 %vm62_vm1, %v4734_v16 }
 0xe3e   :  { %4478 = vmatpush3.msra.mxu1 %v5372_v1  ;;  %4485 = vmatprep.mubr.msk.f32.mxu1 %vm4776_vm0, %v4775_v0 }
 0xe3f   :  { %4479 = vmatprep.subr.mxu1 %v4775_v0 }
 0xe40   :  { %4480 = vmatpush3.msra.mxu1 %v5380_v2 }
 0xe41   :  { %4481 = vmatprep.subr.mxu1 %v4775_v0 }
 0xe42   :  { %4482 = vmatpush3.msra.mxu1 %v5425_v39 }
 0xe43   :  { %4483 = vmatprep.subr.mxu1 %v4775_v0 }
 0xe44   :  { %4484 = vmatpush3.msra.mxu1 %v5432_v63 }
 0xe45   :  { %4499 = vmatprep.subr.mxu1 %v4775_v0 }
 0xefd   :  { %v5453_v17 = vpop.f32.mrf.mxu1 }
 0xefe   :  { %v2169_v18 = vmul.f32 %v5453_v17, %v4895_v10 }
 0xeff   :  { %v4465_v20 = vpop.f32.mrf.mxu1 }
 0xf00   :  { %v2170_v21 = vadd.f32 %v2169_v18, %v5395_v59 }
 0xf02   :  { %v2171_v22 = vadd.f32 %v2170_v21, %v4905_v15 }
 0xf04   :  { %4735 = vtanh.f32 %v2171_v22 }
 0xf11   :  { %v4736_v24 = vpop.eup %4735 }
 0xf12   :  { %4475 = vmatmul.mubr.msk.f32.vlgmr.msra.gmra.mxu0 %vm62_vm1, %v4736_v24  ;;  %v2330_v36 = vadd.f32 %v4736_v24, %v4734_v16  ;;  %v2340_v37 = vmul.f32 %v4736_v24, %v4736_v24 }
 0xf13   :  { %4489 = vmatpush3.msra.mxu0 %v4932_v26  ;;  %4496 = vmatprep.mubr.msk.f32.mxu0 %vm4776_vm0, %v4775_v0 }
 0xf14   :  { %4490 = vmatprep.subr.mxu0 %v4775_v0  ;;  %v2341_v32 = vsub.f32 1.0, %v2340_v37 }
 0xf15   :  { %4491 = vmatpush3.msra.mxu0 %v4937_v27  ;;  %v2336_v27 = vmul.f32 %v4734_v16, %v4734_v16 }
 0xf16   :  { %4492 = vmatprep.subr.mxu0 %v4775_v0  ;;  %v2342_v43 = vmul.f32 2.0, %v2341_v32 }
 0xf17   :  { %4493 = vmatpush3.msra.mxu0 %v4944_v28  ;;  %v2337_v38 = vsub.f32 1.0, %v2336_v27  ;;  %v2331_v28 = vmul.f32 2.0, %v2330_v36 }
 0xf18   :  { %4494 = vmatprep.subr.mxu0 %v4775_v0 }
 0xf19   :  { %4495 = vmatpush3.msra.mxu0 %v4953_v29  ;;  %v2338_v42 = vmul.f32 2.0, %v2337_v38  ;;  %v2332_v29 = vadd.f32 %v4732_v62, %v2331_v28 }
 0xf1a   :  { %4510 = vmatprep.subr.mxu0 %v4775_v0 }
 0xf1b   :  { %v2339_v45 = vadd.f32 %v2338_v42, %v2335_v13 }
 0xf1d   :  { %v2343_v48 = vadd.f32 %v2342_v43, %v2339_v45 }
 0xfd2   :  { %v2242_v3 = vpop.f32.mrf.mxu0 }
 0xfd3   :  { %v2246_v26 = vmul.f32 %v2242_v3, %v4960_v30 }
 0xfd4   :  { %v4476_v31 = vpop.f32.mrf.mxu0 }
 0xfd5   :  { %v2247_v33 = vadd.f32 %v2246_v26, %v5395_v59  ;;  %v5574_v26 = vld [vmem:[%s5848_s4 + $0x18] sm:$0xff]  ;;  %v5583_v31 = vld [vmem:[%s5848_s4 + $0x10] sm:$0xff] }
 0xfd7   :  { %v2248_v35 = vadd.f32 %v2247_v33, %v4968_v34  ;;  %v5590_v33 = vld [vmem:[%s5848_s4 + $0x8] sm:$0xff] }
 0xfd9   :  { %4737 = vtanh.f32 %v2248_v35  ;;  %v5597_v35 = vld [vmem:[%s5848_s4] sm:$0xff] }
 0xfe6   :  { %v4738_v12 = vpop.eup %4737 }
 0xfe7   :  { %4486 = vmatmul.mubr.msk.f32.vlgmr.msra.gmra.mxu1 %vm62_vm1, %v4738_v12  ;;  %v2333_v44 = vadd.f32 %v4738_v12, %v2332_v29  ;;  %v2344_v46 = vmul.f32 %v4738_v12, %v4738_v12 }
 0xfe8   :  { %4500 = vmatpush3.msra.mxu1 %v4977_v47  ;;  %4507 = vmatprep.mubr.msk.f32.mxu1 %vm4776_vm0, %v4775_v0  ;;  %v2323_v47 = vadd.f32 %v2242_v3, %v5453_v17 }
 0xfe9   :  { %4501 = vmatprep.subr.mxu1 %v4775_v0  ;;  %4497 = vmatmul.mubr.msk.f32.vlgmr.msra.gmra.mxu0 %vm62_vm1, %v2333_v44  ;;  %v2345_v25 = vsub.f32 1.0, %v2344_v46 }
 0xfea   :  { %4502 = vmatpush3.msra.mxu1 %v4984_v52  ;;  %4511 = vmatpush3.msra.mxu0 %v5372_v1  ;;  %v2324_v52 = vmul.f32 2.0, %v2323_v47 }
 0xfeb   :  { %4503 = vmatprep.subr.mxu1 %v4775_v0  ;;  %v2346_v51 = vadd.f32 %v2345_v25, %v2343_v48  ;;  %4512 = vmatprep.subr.mxu0 %v4775_v0 }
 0xfec   :  { %4504 = vmatpush3.msra.mxu1 %v4994_v55  ;;  %4513 = vmatpush3.msra.mxu0 %v5380_v2  ;;  %v2325_v55 = vadd.f32 %v2324_v52, %v5436_v6 }
 0xfed   :  { %4505 = vmatprep.subr.mxu1 %v4775_v0  ;;  %4514 = vmatprep.subr.mxu0 %v4775_v0 }
 0xfee   :  { %4506 = vmatpush3.msra.mxu1 %v5002_v58  ;;  %4515 = vmatpush3.msra.mxu0 %v5425_v39 }
 0xfef   :  { %4508 = vmatmul.mubr.msk.f32.vlgmr.msra.gmra.mxu1 %vm62_vm1, %v2346_v51  ;;  %4516 = vmatprep.subr.mxu0 %v4775_v0 }
 0xff0   :  { %4517 = vmatpush3.msra.mxu0 %v5432_v63  ;;  %4518 = vmatprep.mubr.msk.f32.mxu0 %vm4776_vm0, %v4775_v0 }
 0xff1   :  { %4521 = vmatprep.subr.mxu1 %v4775_v0  ;;  %4529 = vmatprep.mubr.msk.f32.mxu1 %vm4776_vm0, %v4775_v0 }
 0xff2   :  { %4522 = vmatpush3.msra.mxu1 %v5372_v1  ;;  %4532 = vmatprep.subr.mxu0 %v4775_v0 }
 0xff3   :  { %4523 = vmatprep.subr.mxu1 %v4775_v0 }
 0xff4   :  { %4524 = vmatpush3.msra.mxu1 %v5380_v2 }
 0xff5   :  { %4525 = vmatprep.subr.mxu1 %v4775_v0 }
 0xff6   :  { %4526 = vmatpush3.msra.mxu1 %v5425_v39 }
 0xff7   :  { %4527 = vmatprep.subr.mxu1 %v4775_v0 }
 0xff8   :  { %4528 = vmatpush3.msra.mxu1 %v5432_v63 }
 0xff9   :  { %4543 = vmatprep.subr.mxu1 %v4775_v0 }
0x10a7   :  { %v2319_v58 = vpop.f32.mrf.mxu1 }
0x10a8   :  { %v2326_v41 = vadd.f32 %v2325_v55, %v2319_v58  ;;  %v5611_v55 = vld [vmem:[%s5849_s7 + $0x18] sm:$0xff] }
0x10a9   :  { %v4487_v53 = vpop.f32.mrf.mxu1  ;;  %v2416_v54 = vpop.f32.mrf.mxu0 }
0x10aa   :  { %v2327_v56 = vmul.f32 %v2326_v41, %v5050_v9  ;;  %v2420_v4 = vmul.f32 %v2416_v54, %v5050_v9  ;;  %v5621_v53 = vld [vmem:[%s5849_s7 + $0x10] sm:$0xff] }
0x10ab   :  { %v4498_v57 = vpop.f32.mrf.mxu0 }
0x10ac   :  { %v2328_v5 = vadd.f32 %v2327_v56, %v5395_v59  ;;  %v2421_v23 = vadd.f32 %v2420_v4, %v5398_v60  ;;  %v5630_v56 = vld [vmem:[%s5849_s7 + $0x8] sm:$0xff]  ;;  %v5639_v4 = vld [vmem:[%s5849_s7] sm:$0xff] }
0x10ae   :  { %v5513_v61 = vadd.f32 %v2328_v5, %v4968_v34  ;;  %v5516_v50 = vadd.f32 %v2421_v23, %v5055_v19 }
0x10af   :  { %v2492_v62 = vpop.f32.mrf.mxu1 }
0x10b0   :  { %4739 = vtanh.f32 %v5513_v61  ;;  %v2496_v6 = vmul.f32 %v2492_v62, %v5050_v9  ;;  %3920 = vst.msk [vmem:[%s5851_s8 + $0x28] sm:$0xff] %vm57_vm2, %v5516_v50 }
0x10b1   :  { %v4509_v59 = vpop.f32.mrf.mxu1 }
0x10b2   :  { %v5526_v60 = vsub.f32 %v5408_v49, %v2496_v6 }
0x10b4   :  { %3921 = vst.msk [vmem:[%s5852_s9 + $0x28] sm:$0xff] %vm59_vm3, %v5526_v60 }
0x10bd   :  { %v5533_v7 = vpop.eup %4739 }
0x10be   :  { %4519 = vmatmul.mubr.msk.f32.vlgmr.msra.gmra.mxu0 %vm62_vm1, %v5533_v7  ;;  %v2818_v43 = vmul.f32 %v5533_v7, %v5533_v7 }
0x10bf   :  { %4533 = vmatpush3.msra.mxu0 %v5372_v1  ;;  %4540 = vmatprep.mubr.msk.f32.mxu0 %vm4776_vm0, %v4775_v0 }
0x10c0   :  { %4534 = vmatprep.subr.mxu0 %v4775_v0  ;;  %v2819_v46 = vsub.f32 1.0, %v2818_v43 }
0x10c1   :  { %4535 = vmatpush3.msra.mxu0 %v5380_v2 }
0x10c2   :  { %4536 = vmatprep.subr.mxu0 %v4775_v0 }
0x10c3   :  { %4537 = vmatpush3.msra.mxu0 %v5425_v39 }
0x10c4   :  { %4538 = vmatprep.subr.mxu0 %v4775_v0 }
0x10c5   :  { %4539 = vmatpush3.msra.mxu0 %v5432_v63 }
0x10c6   :  { %4554 = vmatprep.subr.mxu0 %v4775_v0 }
0x117e   :  { %v5547_v49 = vpop.f32.mrf.mxu0 }
0x117f   :  { %v2576_v8 = vmul.f32 %v5547_v49, %v4895_v10 }
0x1180   :  { %v4520_v11 = vpop.f32.mrf.mxu0 }
0x1181   :  { %v2577_v14 = vadd.f32 %v2576_v8, %v5513_v61 }
0x1183   :  { %v2578_v16 = vadd.f32 %v2577_v14, %v4905_v15 }
0x1185   :  { %4741 = vtanh.f32 %v2578_v16 }
0x1192   :  { %v4742_v17 = vpop.eup %4741 }
0x1193   :  { %4530 = vmatmul.mubr.msk.f32.vlgmr.msra.gmra.mxu1 %vm62_vm1, %v4742_v17  ;;  %v2820_v40 = vmul.f32 %v4742_v17, %v4742_v17 }
0x1194   :  { %4544 = vmatpush3.msra.mxu1 %v5372_v1  ;;  %4551 = vmatprep.mubr.msk.f32.mxu1 %vm4776_vm0, %v4775_v0 }
0x1195   :  { %4545 = vmatprep.subr.mxu1 %v4775_v0  ;;  %v2821_v29 = vsub.f32 1.0, %v2820_v40 }
0x1196   :  { %4546 = vmatpush3.msra.mxu1 %v5380_v2 }
0x1197   :  { %4547 = vmatprep.subr.mxu1 %v4775_v0  ;;  %v2822_v44 = vmul.f32 2.0, %v2821_v29 }
0x1198   :  { %4548 = vmatpush3.msra.mxu1 %v5425_v39 }
0x1199   :  { %4549 = vmatprep.subr.mxu1 %v4775_v0  ;;  %v2823_v47 = vadd.f32 %v2822_v44, %v2819_v46 }
0x119a   :  { %4550 = vmatpush3.msra.mxu1 %v5432_v63 }
0x119b   :  { %4565 = vmatprep.subr.mxu1 %v4775_v0 }
0x1253   :  { %v5564_v18 = vpop.f32.mrf.mxu1 }
0x1254   :  { %v2653_v20 = vmul.f32 %v5564_v18, %v4895_v10 }
0x1255   :  { %v4531_v21 = vpop.f32.mrf.mxu1 }
0x1256   :  { %v2654_v22 = vadd.f32 %v2653_v20, %v5513_v61 }
0x1258   :  { %v2655_v24 = vadd.f32 %v2654_v22, %v4905_v15 }
0x125a   :  { %4743 = vtanh.f32 %v2655_v24 }
0x1267   :  { %v4744_v3 = vpop.eup %4743 }
0x1268   :  { %4541 = vmatmul.mubr.msk.f32.vlgmr.msra.gmra.mxu0 %vm62_vm1, %v4744_v3  ;;  %v2814_v32 = vadd.f32 %v4744_v3, %v4742_v17  ;;  %v2824_v42 = vmul.f32 %v4744_v3, %v4744_v3 }
0x1269   :  { %4555 = vmatpush3.msra.mxu0 %v5574_v26  ;;  %4562 = vmatprep.mubr.msk.f32.mxu0 %vm4776_vm0, %v4775_v0 }
0x126a   :  { %4556 = vmatprep.subr.mxu0 %v4775_v0  ;;  %v2815_v13 = vmul.f32 2.0, %v2814_v32  ;;  %v2825_v12 = vsub.f32 1.0, %v2824_v42 }
0x126b   :  { %4557 = vmatpush3.msra.mxu0 %v5583_v31 }
0x126c   :  { %4558 = vmatprep.subr.mxu0 %v4775_v0  ;;  %v2816_v45 = vadd.f32 %v5533_v7, %v2815_v13  ;;  %v2826_v48 = vmul.f32 2.0, %v2825_v12 }
0x126d   :  { %4559 = vmatpush3.msra.mxu0 %v5590_v33 }
0x126e   :  { %4560 = vmatprep.subr.mxu0 %v4775_v0  ;;  %v2827_v58 = vadd.f32 %v2826_v48, %v2823_v47 }
0x126f   :  { %4561 = vmatpush3.msra.mxu0 %v5597_v35 }
0x1270   :  { %4576 = vmatprep.subr.mxu0 %v4775_v0 }
0x1328   :  { %v2726_v27 = vpop.f32.mrf.mxu0 }
0x1329   :  { %v2730_v36 = vmul.f32 %v2726_v27, %v4960_v30  ;;  %v2807_v57 = vadd.f32 %v2726_v27, %v5564_v18 }
0x132a   :  { %v4542_v37 = vpop.f32.mrf.mxu0 }
0x132b   :  { %v2731_v38 = vadd.f32 %v2730_v36, %v5513_v61  ;;  %v2808_v5 = vmul.f32 2.0, %v2807_v57 }
0x132d   :  { %v2732_v28 = vadd.f32 %v2731_v38, %v4968_v34  ;;  %v2809_v23 = vadd.f32 %v2808_v5, %v5547_v49 }
0x132f   :  { %4745 = vtanh.f32 %v2732_v28 }
0x133c   :  { %v4746_v25 = vpop.eup %4745 }
0x133d   :  { %4552 = vmatmul.mubr.msk.f32.vlgmr.msra.gmra.mxu1 %vm62_vm1, %v4746_v25  ;;  %v2817_v51 = vadd.f32 %v4746_v25, %v2816_v45  ;;  %v2828_v52 = vmul.f32 %v4746_v25, %v4746_v25 }
0x133e   :  { %4566 = vmatpush3.msra.mxu1 %v5611_v55  ;;  %4573 = vmatprep.mubr.msk.f32.mxu1 %vm4776_vm0, %v4775_v0 }
0x133f   :  { %4567 = vmatprep.subr.mxu1 %v4775_v0  ;;  %4563 = vmatmul.mubr.msk.f32.vlgmr.msra.gmra.mxu0 %vm62_vm1, %v2817_v51  ;;  %v2829_v41 = vsub.f32 1.0, %v2828_v52 }
0x1340   :  { %4568 = vmatpush3.msra.mxu1 %v5621_v53  ;;  %4577 = vmatpush3.msra.mxu0 %v5372_v1 }
0x1341   :  { %4569 = vmatprep.subr.mxu1 %v4775_v0  ;;  %v2830_v54 = vadd.f32 %v2829_v41, %v2827_v58  ;;  %4578 = vmatprep.subr.mxu0 %v4775_v0 }
0x1342   :  { %4570 = vmatpush3.msra.mxu1 %v5630_v56  ;;  %4579 = vmatpush3.msra.mxu0 %v5380_v2 }
0x1343   :  { %4571 = vmatprep.subr.mxu1 %v4775_v0  ;;  %4580 = vmatprep.subr.mxu0 %v4775_v0 }
0x1344   :  { %4572 = vmatpush3.msra.mxu1 %v5639_v4  ;;  %4581 = vmatpush3.msra.mxu0 %v5425_v39 }
0x1345   :  { %4574 = vmatmul.mubr.msk.f32.vlgmr.msra.gmra.mxu1 %vm62_vm1, %v2830_v54  ;;  %4582 = vmatprep.subr.mxu0 %v4775_v0 }
0x1346   :  { %4583 = vmatpush3.msra.mxu0 %v5432_v63  ;;  %4584 = vmatprep.mubr.msk.f32.mxu0 %vm4776_vm0, %v4775_v0 }
0x1347   :  { %4587 = vmatprep.subr.mxu1 %v4775_v0  ;;  %4595 = vmatprep.mubr.msk.f32.mxu1 %vm4776_vm0, %v4775_v0 }
0x1348   :  { %4588 = vmatpush3.msra.mxu1 %v5372_v1  ;;  %4598 = vmatprep.subr.mxu0 %v4775_v0 }
0x1349   :  { %4589 = vmatprep.subr.mxu1 %v4775_v0 }
0x134a   :  { %4590 = vmatpush3.msra.mxu1 %v5380_v2 }
0x134b   :  { %4591 = vmatprep.subr.mxu1 %v4775_v0 }
0x134c   :  { %4592 = vmatpush3.msra.mxu1 %v5425_v39 }
0x134d   :  { %4593 = vmatprep.subr.mxu1 %v4775_v0 }
0x134e   :  { %4594 = vmatpush3.msra.mxu1 %v5432_v63 }
0x134f   :  { %4609 = vmatprep.subr.mxu1 %v4775_v0 }
0x13fd   :  { %v2803_v62 = vpop.f32.mrf.mxu1 }
0x13fe   :  { %v2810_v6 = vadd.f32 %v2809_v23, %v2803_v62 }
0x13ff   :  { %v4553_v59 = vpop.f32.mrf.mxu1  ;;  %v2900_v7 = vpop.f32.mrf.mxu0 }
0x1400   :  { %v2811_v8 = vmul.f32 %v2810_v6, %v5050_v9  ;;  %v2904_v11 = vmul.f32 %v2900_v7, %v5050_v9 }
0x1401   :  { %v4564_v14 = vpop.f32.mrf.mxu0 }
0x1402   :  { %v2812_v16 = vadd.f32 %v2811_v8, %v5513_v61  ;;  %v2905_v17 = vadd.f32 %v2904_v11, %v5516_v50 }
0x1404   :  { %v5667_v20 = vadd.f32 %v2812_v16, %v4968_v34  ;;  %v5670_v18 = vadd.f32 %v2905_v17, %v5055_v19 }
0x1405   :  { %v2976_v49 = vpop.f32.mrf.mxu1 }
0x1406   :  { %4747 = vtanh.f32 %v5667_v20  ;;  %v2980_v21 = vmul.f32 %v2976_v49, %v5050_v9  ;;  %3928 = vst.msk [vmem:[%s5851_s8 + $0x30] sm:$0xff] %vm57_vm2, %v5670_v18 }
0x1407   :  { %v4575_v61 = vpop.f32.mrf.mxu1 }
0x1408   :  { %v5680_v50 = vsub.f32 %v5526_v60, %v2980_v21 }
0x140a   :  { %3929 = vst.msk [vmem:[%s5852_s9 + $0x30] sm:$0xff] %vm59_vm3, %v5680_v50 }
0x1413   :  { %v4748_v22 = vpop.eup %4747 }
0x1414   :  { %4585 = vmatmul.mubr.msk.f32.vlgmr.msra.gmra.mxu0 %vm62_vm1, %v4748_v22  ;;  %v3302_v52 = vmul.f32 %v4748_v22, %v4748_v22 }
0x1415   :  { %4599 = vmatpush3.msra.mxu0 %v5372_v1  ;;  %4606 = vmatprep.mubr.msk.f32.mxu0 %vm4776_vm0, %v4775_v0 }
0x1416   :  { %4600 = vmatprep.subr.mxu0 %v4775_v0  ;;  %v3303_v57 = vsub.f32 1.0, %v3302_v52 }
0x1417   :  { %4601 = vmatpush3.msra.mxu0 %v5380_v2 }
0x1418   :  { %4602 = vmatprep.subr.mxu0 %v4775_v0 }
0x1419   :  { %4603 = vmatpush3.msra.mxu0 %v5425_v39 }
0x141a   :  { %4604 = vmatprep.subr.mxu0 %v4775_v0 }
0x141b   :  { %4605 = vmatpush3.msra.mxu0 %v5432_v63 }
0x141c   :  { %4620 = vmatprep.subr.mxu0 %v4775_v0 }
0x14d4   :  { %v5698_v60 = vpop.f32.mrf.mxu0 }
0x14d5   :  { %v3060_v24 = vmul.f32 %v5698_v60, %v4895_v10 }
0x14d6   :  { %v4586_v3 = vpop.f32.mrf.mxu0 }
0x14d7   :  { %v3061_v27 = vadd.f32 %v3060_v24, %v5667_v20 }
0x14d9   :  { %v3062_v36 = vadd.f32 %v3061_v27, %v4905_v15 }
0x14db   :  { %4749 = vtanh.f32 %v3062_v36 }
0x14e8   :  { %v4750_v37 = vpop.eup %4749 }
0x14e9   :  { %4596 = vmatmul.mubr.msk.f32.vlgmr.msra.gmra.mxu1 %vm62_vm1, %v4750_v37  ;;  %v3304_v46 = vmul.f32 %v4750_v37, %v4750_v37 }
0x14ea   :  { %4610 = vmatpush3.msra.mxu1 %v5372_v1  ;;  %4617 = vmatprep.mubr.msk.f32.mxu1 %vm4776_vm0, %v4775_v0 }
0x14eb   :  { %4611 = vmatprep.subr.mxu1 %v4775_v0  ;;  %v3305_v51 = vsub.f32 1.0, %v3304_v46 }
0x14ec   :  { %4612 = vmatpush3.msra.mxu1 %v5380_v2 }
0x14ed   :  { %4613 = vmatprep.subr.mxu1 %v4775_v0  ;;  %v3306_v41 = vmul.f32 2.0, %v3305_v51 }
0x14ee   :  { %4614 = vmatpush3.msra.mxu1 %v5425_v39 }
0x14ef   :  { %4615 = vmatprep.subr.mxu1 %v4775_v0  ;;  %v3307_v6 = vadd.f32 %v3306_v41, %v3303_v57 }
0x14f0   :  { %4616 = vmatpush3.msra.mxu1 %v5432_v63 }
0x14f1   :  { %4631 = vmatprep.subr.mxu1 %v4775_v0 }
0x15a9   :  { %v5715_v38 = vpop.f32.mrf.mxu1 }
0x15aa   :  { %v3137_v28 = vmul.f32 %v5715_v38, %v4895_v10 }
0x15ab   :  { %v4597_v40 = vpop.f32.mrf.mxu1 }
0x15ac   :  { %v3138_v32 = vadd.f32 %v3137_v28, %v5667_v20 }
0x15ae   :  { %v3139_v42 = vadd.f32 %v3138_v32, %v4905_v15 }
0x15b0   :  { %4751 = vtanh.f32 %v3139_v42 }
0x15bd   :  { %v4752_v29 = vpop.eup %4751 }
0x15be   :  { %4607 = vmatmul.mubr.msk.f32.vlgmr.msra.gmra.mxu0 %vm62_vm1, %v4752_v29  ;;  %v3298_v48 = vadd.f32 %v4752_v29, %v4750_v37  ;;  %v3308_v25 = vmul.f32 %v4752_v29, %v4752_v29 }
0x15bf   :  { %4621 = vmatpush3.msra.mxu0 %v5574_v26  ;;  %4628 = vmatprep.mubr.msk.f32.mxu0 %vm4776_vm0, %v4775_v0 }
0x15c0   :  { %4622 = vmatprep.subr.mxu0 %v4775_v0  ;;  %v3299_v47 = vmul.f32 2.0, %v3298_v48  ;;  %v3309_v58 = vsub.f32 1.0, %v3308_v25 }
0x15c1   :  { %4623 = vmatpush3.msra.mxu0 %v5583_v31 }
0x15c2   :  { %4624 = vmatprep.subr.mxu0 %v4775_v0  ;;  %v3300_v54 = vadd.f32 %v4748_v22, %v3299_v47  ;;  %v3310_v5 = vmul.f32 2.0, %v3309_v58 }
0x15c3   :  { %4625 = vmatpush3.msra.mxu0 %v5590_v33 }
0x15c4   :  { %4626 = vmatprep.subr.mxu0 %v4775_v0  ;;  %v3311_v7 = vadd.f32 %v3310_v5, %v3307_v6 }
0x15c5   :  { %4627 = vmatpush3.msra.mxu0 %v5597_v35 }
0x15c6   :  { %4642 = vmatprep.subr.mxu0 %v4775_v0 }
0x167e   :  { %v3210_v13 = vpop.f32.mrf.mxu0 }
0x167f   :  { %v3214_v43 = vmul.f32 %v3210_v13, %v4960_v30  ;;  %v3291_v14 = vadd.f32 %v3210_v13, %v5715_v38 }
0x1680   :  { %v4608_v12 = vpop.f32.mrf.mxu0 }
0x1681   :  { %v3215_v44 = vadd.f32 %v3214_v43, %v5667_v20  ;;  %v3292_v16 = vmul.f32 2.0, %v3291_v14 }
0x1683   :  { %v3216_v45 = vadd.f32 %v3215_v44, %v4968_v34  ;;  %v3293_v17 = vadd.f32 %v3292_v16, %v5698_v60 }
0x1685   :  { %4753 = vtanh.f32 %v3216_v45 }
0x1692   :  { %v4754_v23 = vpop.eup %4753 }
0x1693   :  { %4618 = vmatmul.mubr.msk.f32.vlgmr.msra.gmra.mxu1 %vm62_vm1, %v4754_v23  ;;  %v3301_v62 = vadd.f32 %v4754_v23, %v3300_v54  ;;  %v3312_v59 = vmul.f32 %v4754_v23, %v4754_v23 }
0x1694   :  { %4632 = vmatpush3.msra.mxu1 %v5611_v55  ;;  %4639 = vmatprep.mubr.msk.f32.mxu1 %vm4776_vm0, %v4775_v0 }
0x1695   :  { %4633 = vmatprep.subr.mxu1 %v4775_v0  ;;  %4629 = vmatmul.mubr.msk.f32.vlgmr.msra.gmra.mxu0 %vm62_vm1, %v3301_v62  ;;  %v3313_v8 = vsub.f32 1.0, %v3312_v59 }
0x1696   :  { %4634 = vmatpush3.msra.mxu1 %v5621_v53  ;;  %4643 = vmatpush3.msra.mxu0 %v5372_v1 }
0x1697   :  { %4635 = vmatprep.subr.mxu1 %v4775_v0  ;;  %v3314_v11 = vadd.f32 %v3313_v8, %v3311_v7  ;;  %4644 = vmatprep.subr.mxu0 %v4775_v0 }
0x1698   :  { %4636 = vmatpush3.msra.mxu1 %v5630_v56  ;;  %4645 = vmatpush3.msra.mxu0 %v5380_v2 }
0x1699   :  { %4637 = vmatprep.subr.mxu1 %v4775_v0  ;;  %4646 = vmatprep.subr.mxu0 %v4775_v0 }
0x169a   :  { %4638 = vmatpush3.msra.mxu1 %v5639_v4  ;;  %4647 = vmatpush3.msra.mxu0 %v5425_v39 }
0x169b   :  { %4640 = vmatmul.mubr.msk.f32.vlgmr.msra.gmra.mxu1 %vm62_vm1, %v3314_v11  ;;  %4648 = vmatprep.subr.mxu0 %v4775_v0 }
0x169c   :  { %4649 = vmatpush3.msra.mxu0 %v5432_v63  ;;  %4650 = vmatprep.mubr.msk.f32.mxu0 %vm4776_vm0, %v4775_v0 }
0x169d   :  { %4653 = vmatprep.subr.mxu1 %v4775_v0  ;;  %4661 = vmatprep.mubr.msk.f32.mxu1 %vm4776_vm0, %v4775_v0 }
0x169e   :  { %4654 = vmatpush3.msra.mxu1 %v5372_v1  ;;  %4664 = vmatprep.subr.mxu0 %v4775_v0 }
0x169f   :  { %4655 = vmatprep.subr.mxu1 %v4775_v0 }
0x16a0   :  { %4656 = vmatpush3.msra.mxu1 %v5380_v2 }
0x16a1   :  { %4657 = vmatprep.subr.mxu1 %v4775_v0 }
0x16a2   :  { %4658 = vmatpush3.msra.mxu1 %v5425_v39 }
0x16a3   :  { %4659 = vmatprep.subr.mxu1 %v4775_v0 }
0x16a4   :  { %4660 = vmatpush3.msra.mxu1 %v5432_v63 }
0x16a5   :  { %4675 = vmatprep.subr.mxu1 %v4775_v0 }
0x1753   :  { %v3287_v49 = vpop.f32.mrf.mxu1 }
0x1754   :  { %v3294_v21 = vadd.f32 %v3293_v17, %v3287_v49 }
0x1755   :  { %v4619_v61 = vpop.f32.mrf.mxu1  ;;  %v3384_v22 = vpop.f32.mrf.mxu0 }
0x1756   :  { %v3295_v24 = vmul.f32 %v3294_v21, %v5050_v9  ;;  %v3388_v3 = vmul.f32 %v3384_v22, %v5050_v9 }
0x1757   :  { %v4630_v27 = vpop.f32.mrf.mxu0 }
0x1758   :  { %v3296_v36 = vadd.f32 %v3295_v24, %v5667_v20  ;;  %v3389_v37 = vadd.f32 %v3388_v3, %v5670_v18 }
0x175a   :  { %v3297_v28 = vadd.f32 %v3296_v36, %v4968_v34  ;;  %v5776_v38 = vadd.f32 %v3389_v37, %v5055_v19 }
0x175b   :  { %v3460_v40 = vpop.f32.mrf.mxu1 }
0x175c   :  { %4755 = vtanh.f32 %v3297_v28  ;;  %v3464_v60 = vmul.f32 %v3460_v40, %v5050_v9  ;;  %3936 = vst.msk [vmem:[%s5851_s8 + $0x38] sm:$0xff] %vm57_vm2, %v5776_v38 }
0x175d   :  { %v4641_v32 = vpop.f32.mrf.mxu1 }
0x175e   :  { %v5785_v20 = vsub.f32 %v5680_v50, %v3464_v60 }
0x1760   :  { %3937 = vst.msk [vmem:[%s5852_s9 + $0x38] sm:$0xff] %vm59_vm3, %v5785_v20 }
0x1769   :  { %v4756_v18 = vpop.eup %4755 }
0x176a   :  { %4651 = vmatmul.mubr.msk.f32.vlgmr.msra.gmra.mxu0 %vm62_vm1, %v4756_v18  ;;  %v3706_v25 = vmul.f32 %v4756_v18, %v4756_v18 }
0x176b   :  { %4665 = vmatpush3.msra.mxu0 %v5372_v1  ;;  %4672 = vmatprep.mubr.msk.f32.mxu0 %vm4776_vm0, %v4775_v0 }
0x176c   :  { %4666 = vmatprep.subr.mxu0 %v4775_v0 }
0x176d   :  { %4667 = vmatpush3.msra.mxu0 %v5380_v2 }
0x176e   :  { %4668 = vmatprep.subr.mxu0 %v4775_v0 }
0x176f   :  { %4669 = vmatpush3.msra.mxu0 %v5425_v39 }
0x1770   :  { %4670 = vmatprep.subr.mxu0 %v4775_v0 }
0x1771   :  { %4671 = vmatpush3.msra.mxu0 %v5432_v63 }
0x1772   :  { %4686 = vmatprep.subr.mxu0 %v4775_v0 }
0x182a   :  { %v3540_v50 = vpop.f32.mrf.mxu0 }
0x182b   :  { %v3544_v1 = vmul.f32 %v3540_v50, %v4895_v10 }
0x182c   :  { %v4652_v42 = vpop.f32.mrf.mxu0 }
0x182d   :  { %v3545_v29 = vadd.f32 %v3544_v1, %v3297_v28 }
0x182f   :  { %v3546_v13 = vadd.f32 %v3545_v29, %v4905_v15 }
0x1831   :  { %4757 = vtanh.f32 %v3546_v13 }
0x183e   :  { %v4758_v43 = vpop.eup %4757 }
0x183f   :  { %4662 = vmatmul.mubr.msk.f32.vlgmr.msra.gmra.mxu1 %vm62_vm1, %v4758_v43 }
0x1840   :  { %4676 = vmatpush3.msra.mxu1 %v5574_v26  ;;  %4683 = vmatprep.mubr.msk.f32.mxu1 %vm4776_vm0, %v4775_v0 }
0x1841   :  { %4677 = vmatprep.subr.mxu1 %v4775_v0 }
0x1842   :  { %4678 = vmatpush3.msra.mxu1 %v5583_v31 }
0x1843   :  { %4679 = vmatprep.subr.mxu1 %v4775_v0 }
0x1844   :  { %4680 = vmatpush3.msra.mxu1 %v5590_v33 }
0x1845   :  { %4681 = vmatprep.subr.mxu1 %v4775_v0 }
0x1846   :  { %4682 = vmatpush3.msra.mxu1 %v5597_v35 }
0x18ff   :  { %v3617_v2 = vpop.f32.mrf.mxu1 }
0x1900   :  { %v3621_v39 = vmul.f32 %v3617_v2, %v4895_v10 }
0x1901   :  { %v4663_v63 = vpop.f32.mrf.mxu1 }
0x1902   :  { %v3622_v26 = vadd.f32 %v3621_v39, %v3297_v28 }
0x1904   :  { %v3623_v12 = vadd.f32 %v3622_v26, %v4905_v15 }
0x1906   :  { %4759 = vtanh.f32 %v3623_v12 }
0x1913   :  { %v4760_v44 = vpop.eup %4759 }
0x1914   :  { %4673 = vmatmul.mubr.msk.f32.vlgmr.msra.gmra.mxu0 %vm62_vm1, %v4760_v44  ;;  %v3702_v45 = vadd.f32 %v4760_v44, %v4758_v43  ;;  %v3712_v46 = vmul.f32 %v4760_v44, %v4760_v44 }
0x1915   :  { %4687 = vmatpush3.msra.mxu0 %v5611_v55  ;;  %4694 = vmatprep.mubr.msk.f32.mxu0 %vm4776_vm0, %v4775_v0  ;;  %v3708_v55 = vmul.f32 %v4758_v43, %v4758_v43 }
0x1916   :  { %4688 = vmatprep.subr.mxu0 %v4775_v0  ;;  %v3703_v48 = vmul.f32 2.0, %v3702_v45  ;;  %v3713_v51 = vsub.f32 1.0, %v3712_v46 }
0x1917   :  { %4689 = vmatpush3.msra.mxu0 %v5621_v53  ;;  %v3709_v53 = vsub.f32 1.0, %v3708_v55 }
0x1918   :  { %4690 = vmatprep.subr.mxu0 %v4775_v0  ;;  %v3704_v47 = vadd.f32 %v4756_v18, %v3703_v48  ;;  %v3714_v52 = vmul.f32 2.0, %v3713_v51 }
0x1919   :  { %4691 = vmatpush3.msra.mxu0 %v5630_v56  ;;  %v3710_v56 = vmul.f32 2.0, %v3709_v53 }
0x191a   :  { %4692 = vmatprep.subr.mxu0 %v4775_v0  ;;  %v3707_v0 = vsub.f32 1.0, %v3706_v25 }
0x191b   :  { %4693 = vmatpush3.msra.mxu0 %v5639_v4 }
0x191c   :  { %v3711_v41 = vadd.f32 %v3710_v56, %v3707_v0 }
0x191e   :  { %v3715_v54 = vadd.f32 %v3714_v52, %v3711_v41 }
0x19d4   :  { %v3694_v10 = vpop.f32.mrf.mxu0 }
0x19d5   :  { %v3698_v15 = vmul.f32 %v3694_v10, %v4960_v30 }
0x19d6   :  { %v4674_v31 = vpop.f32.mrf.mxu0 }
0x19d7   :  { %v3699_v33 = vadd.f32 %v3698_v15, %v3297_v28 }
0x19d9   :  { %v3700_v35 = vadd.f32 %v3699_v33, %v4968_v34 }
0x19db   :  { %4761 = vtanh.f32 %v3700_v35 }
0x19e8   :  { %v4762_v4 = vpop.eup %4761 }
0x19e9   :  { %v3705_v58 = vadd.f32 %v4762_v4, %v3704_v47  ;;  %v3716_v30 = vmul.f32 %v4762_v4, %v4762_v4 }
0x19eb   :  { %4684 = vmatmul.mubr.msk.f32.vlgmr.msra.gmra.mxu1 %vm62_vm1, %v3705_v58  ;;  %v3717_v34 = vsub.f32 1.0, %v3716_v30 }
0x19ed   :  { %v3718_v57 = vadd.f32 %v3717_v34, %v3715_v54 }
0x19ef   :  { %4695 = vmatmul.mubr.msk.f32.vlgmr.msra.gmra.mxu0 %vm62_vm1, %v3718_v57 }
0x1aab   :  { %v3788_v5 = vpop.f32.mrf.mxu1 }
0x1aac   :  { %v3792_v23 = vmul.f32 %v3788_v5, %v5050_v9 }
0x1aad   :  { %v4685_v62 = vpop.f32.mrf.mxu1 }
0x1aae   :  { %v3793_v6 = vadd.f32 %v3792_v23, %v5776_v38 }
0x1aaf   :  { %v3864_v59 = vpop.f32.mrf.mxu0 }
0x1ab0   :  { %v3794_v7 = vadd.f32 %v3793_v6, %v5055_v19  ;;  %v3868_v8 = vmul.f32 %v3864_v59, %v5050_v9 }
0x1ab1   :  { %v4696_v11 = vpop.f32.mrf.mxu0 }
0x1ab2   :  { %3943 = vst.msk [vmem:[%s5851_s8 + $0x40] sm:$0xff] %vm57_vm2, %v3794_v7  ;;  %v3869_v14 = vsub.f32 %v5785_v20, %v3868_v8 }
0x1ab4   :  { %3944 = vst.msk [vmem:[%s5852_s9 + $0x40] sm:$0xff] %vm59_vm3, %v3869_v14 }

</bundles_post_ra>
